<compile_context>
chip_gen: v7x
topology: tpu7x:2x2x1
jax: 0.10.0
libtpu: 0.0.40
codegen_flags: <defaults>
</compile_context>

<pallas_src>
import functools
import math

import jax
import jax.numpy as jnp
from jax.experimental import pallas as pl
from jax.experimental.pallas import tpu as pltpu

_VMEM_LIMIT = 32 * 1024 * 1024  # within scoped-VMEM budget on v5e/v6e/v7x


def _pick_tile(dim, target, align):
    """Largest tile <= target that divides `dim` and is a multiple of `align`;
    falls back to the full dimension (full dims are always legal block shapes)."""
    if dim <= target or dim % align != 0:
        return dim
    t = (target // align) * align
    while t >= align:
        if dim % t == 0:
            return t
        t -= align
    return dim


# ----------------------------- Pallas kernels ------------------------------------

def _matmul_bias_act_kernel(x_ref, w_ref, b_ref, o_ref, acc_ref, *, activation):
    """Tiled GEMM: bf16 (or native dtype) operands -> f32 accumulator; bias-add and
    optional activation only at the k-finalize step."""
    @pl.when(pl.program_id(2) == 0)
    def _():
        acc_ref[...] = jnp.zeros_like(acc_ref)

    acc_ref[...] += jnp.dot(x_ref[...], w_ref[...],
                            preferred_element_type=jnp.float32)

    @pl.when(pl.program_id(2) == pl.num_programs(2) - 1)
    def _():
        y = acc_ref[...] + b_ref[...]
        if activation == "tanh":
            y = jnp.tanh(y)
        elif activation == "gelu":
            # TODO(synk): HF RoBERTa uses exact erf-GELU; tanh approximation kept here
            # (tiny numerical drift vs. the pretrained reference, irrelevant for
            # synthetic weights).
            y = jax.nn.gelu(y)
        o_ref[...] = y.astype(o_ref.dtype)


def matmul_bias_act(x, w, b, activation="none", out_dtype=None):
    m, k = x.shape
    _, n = w.shape
    out_dtype = out_dtype or x.dtype
    tm = _pick_tile(m, 256, 8)
    tn = _pick_tile(n, 256, 128)
    tk = _pick_tile(k, 512, 128)
    grid = (m // tm, n // tn, k // tk)
    return pl.pallas_call(
        functools.partial(_matmul_bias_act_kernel, activation=activation),
        out_shape=jax.ShapeDtypeStruct((m, n), out_dtype),
        grid=grid,
        in_specs=[pl.BlockSpec((tm, tk), lambda i, j, kk: (i, kk)),
                  pl.BlockSpec((tk, tn), lambda i, j, kk: (kk, j)),
                  pl.BlockSpec((1, tn), lambda i, j, kk: (0, j))],
        out_specs=pl.BlockSpec((tm, tn), lambda i, j, kk: (i, j)),
        scratch_shapes=[pltpu.VMEM((tm, tn), jnp.float32)],
        compiler_params=pltpu.CompilerParams(
            dimension_semantics=("parallel", "parallel", "arbitrary"),
            vmem_limit_bytes=_VMEM_LIMIT),
        cost_estimate=pl.CostEstimate(
            flops=2 * m * n * k,
            transcendentals=m * n if activation != "none" else 0,
            bytes_accessed=(m * k + k * n) * x.dtype.itemsize
                           + m * n * jnp.dtype(out_dtype).itemsize),
    )(x, w, b.reshape(1, n).astype(jnp.float32))


def _matmul_residual_ln_kernel(x_ref, w_ref, b_ref, res_ref, g_ref, beta_ref,
                               o_ref, *, eps):
    """Fused: y = x @ w + b + residual ; out = LayerNorm(y) * gamma + beta."""
    y = jnp.dot(x_ref[...], w_ref[...], preferred_element_type=jnp.float32)
    y = y + b_ref[...] + res_ref[...].astype(jnp.float32)
    mean = jnp.mean(y, axis=-1, keepdims=True)
    var = jnp.mean(jnp.square(y - mean), axis=-1, keepdims=True)
    z = (y - mean) * jax.lax.rsqrt(var + eps)
    o_ref[...] = (z * g_ref[...] + beta_ref[...]).astype(o_ref.dtype)


def matmul_residual_ln(x, w, b, res, gamma, beta, eps=1e-5, out_dtype=None):
    m, k = x.shape
    _, n = w.shape
    out_dtype = out_dtype or res.dtype
    tm = _pick_tile(m, 256, 8)
    return pl.pallas_call(
        functools.partial(_matmul_residual_ln_kernel, eps=eps),
        out_shape=jax.ShapeDtypeStruct((m, n), out_dtype),
        grid=(m // tm,),
        in_specs=[pl.BlockSpec((tm, k), lambda i: (i, 0)),
                  pl.BlockSpec((k, n), lambda i: (0, 0)),
                  pl.BlockSpec((1, n), lambda i: (0, 0)),
                  pl.BlockSpec((tm, n), lambda i: (i, 0)),
                  pl.BlockSpec((1, n), lambda i: (0, 0)),
                  pl.BlockSpec((1, n), lambda i: (0, 0))],
        out_specs=pl.BlockSpec((tm, n), lambda i: (i, 0)),
        compiler_params=pltpu.CompilerParams(
            dimension_semantics=("parallel",),
            vmem_limit_bytes=_VMEM_LIMIT),
        cost_estimate=pl.CostEstimate(
            flops=2 * m * n * k, transcendentals=m,
            bytes_accessed=(m * k + k * n + 2 * m * n) * x.dtype.itemsize),
    )(x, w, b.reshape(1, n).astype(jnp.float32), res,
      gamma.reshape(1, n), beta.reshape(1, n))


def _layernorm_kernel(x_ref, g_ref, b_ref, o_ref, *, eps):
    x = x_ref[...].astype(jnp.float32)
    mean = jnp.mean(x, axis=-1, keepdims=True)
    var = jnp.mean(jnp.square(x - mean), axis=-1, keepdims=True)
    y = (x - mean) * jax.lax.rsqrt(var + eps)
    o_ref[...] = (y * g_ref[...] + b_ref[...]).astype(o_ref.dtype)


def layernorm(x, gamma, beta, eps=1e-5):
    m, h = x.shape
    tm = _pick_tile(m, 512, 8)
    return pl.pallas_call(
        functools.partial(_layernorm_kernel, eps=eps),
        out_shape=jax.ShapeDtypeStruct((m, h), x.dtype),
        grid=(m // tm,),
        in_specs=[pl.BlockSpec((tm, h), lambda i: (i, 0)),
                  pl.BlockSpec((1, h), lambda i: (0, 0)),
                  pl.BlockSpec((1, h), lambda i: (0, 0))],
        out_specs=pl.BlockSpec((tm, h), lambda i: (i, 0)),
        compiler_params=pltpu.CompilerParams(
            dimension_semantics=("parallel",),
            vmem_limit_bytes=_VMEM_LIMIT),
    )(x, gamma.reshape(1, h), beta.reshape(1, h))


def _attention_kernel(qkv_ref, m_ref, o_ref, *, num_heads, head_dim):
    """Per-batch masked softmax attention; heads stay folded in the lane dim."""
    hsz = num_heads * head_dim
    qkv = qkv_ref[0]                         # (S, 3H) in native (bf16) dtype
    bias = m_ref[0].astype(jnp.float32)      # (1, S) additive key mask
    outs = []
    for hh in range(num_heads):
        lo = hh * head_dim
        qh = qkv[:, lo:lo + head_dim]                        # (S, d)
        kh = qkv[:, hsz + lo:hsz + lo + head_dim]            # (S, d)
        vh = qkv[:, 2 * hsz + lo:2 * hsz + lo + head_dim]    # (S, d)
        # q already carries 1/sqrt(d) (folded into the Q projection weights).
        s = jax.lax.dot_general(qh, kh, (((1,), (1,)), ((), ())),
                                preferred_element_type=jnp.float32)  # (S, S)
        s = s + bias
        mmax = jnp.max(s, axis=-1, keepdims=True)
        p = jnp.exp(s - mmax)
        denom = jnp.maximum(jnp.sum(p, axis=-1, keepdims=True), 1e-20)  # guard fully-masked rows
        p = p * pl.reciprocal(denom, approx=True)                        # EUP, not a VALU divide
        outs.append(jnp.dot(p.astype(vh.dtype), vh,
                            preferred_element_type=jnp.float32))
    o_ref[0] = jnp.concatenate(outs, axis=-1).astype(o_ref.dtype)


def attention(qkv, mask_bias, *, num_heads, head_dim):
    bsz, s, three_h = qkv.shape
    h = three_h // 3
    return pl.pallas_call(
        functools.partial(_attention_kernel, num_heads=num_heads, head_dim=head_dim),
        out_shape=jax.ShapeDtypeStruct((bsz, s, h), qkv.dtype),
        grid=(bsz,),
        in_specs=[pl.BlockSpec((1, s, three_h), lambda b: (b, 0, 0)),
                  pl.BlockSpec((1, 1, s), lambda b: (b, 0, 0))],
        out_specs=pl.BlockSpec((1, s, h), lambda b: (b, 0, 0)),
        compiler_params=pltpu.CompilerParams(
            dimension_semantics=("parallel",),
            vmem_limit_bytes=_VMEM_LIMIT),
    )(qkv, mask_bias)


# ----------------------------- Model (glue + kernels) ----------------------------

def encoder_layer(h, mask_bias, p, *, num_heads, head_dim):
    B, S, H = h.shape
    x2 = h.reshape(B * S, H)

    # Fused QKV projection: one GEMM, lane-dense 3H output.
    qkv = matmul_bias_act(x2, p["w_qkv"], p["b_qkv"])                 # (B*S, 3H)
    attn = attention(qkv.reshape(B, S, 3 * H), mask_bias,
                     num_heads=num_heads, head_dim=head_dim)          # (B, S, H)

    # Attention output projection + residual + LayerNorm (fused).
    h1 = matmul_residual_ln(attn.reshape(B * S, H), p["wo"], p["bo"],
                            x2, p["ln1_g"], p["ln1_b"])

    # FFN: w1+GELU, then w2 + residual + LayerNorm (fused).
    ff = matmul_bias_act(h1, p["w1"], p["b1"], activation="gelu")
    h2 = matmul_residual_ln(ff, p["w2"], p["b2"], h1, p["ln2_g"], p["ln2_b"])
    return h2.reshape(B, S, H)


def simcse_wrap_forward(params, tokens, input_masks, *, num_heads, head_dim, length):
    B, S = tokens.shape
    H = params["tok_emb"].shape[-1]

    # Embedding gather stays in glue; embedding LayerNorm is a kernel (no zero residual).
    word = jnp.take(params["tok_emb"], tokens, axis=0)                 # (B, S, H)
    pos = params["pos_emb"][:S][None, :, :]                            # (1, S, H)
    emb = (word + pos).reshape(B * S, H)
    h = layernorm(emb, params["emb_ln_g"], params["emb_ln_b"]).reshape(B, S, H)

    # Additive attention-mask bias: 0 where attended, -1e9 where padded.  (B, 1, S)
    mask_bias = ((1.0 - input_masks.astype(jnp.float32)) * -1e9).reshape(B, 1, S)

    for lp in params["layers"]:
        h = encoder_layer(h, mask_bias, lp, num_heads=num_heads, head_dim=head_dim)

    # output[0][:, 0, :] -> CLS embedding, then fc + tanh (padded to 128 lanes, slice back).
    cls = h[:, 0, :]                                                   # (B, H)
    feats = matmul_bias_act(cls, params["fc_w"], params["fc_b"],
                            activation="tanh", out_dtype=jnp.float32)  # (B, FC_PAD)
    return feats[:, :length]


# ----------------------------- Deterministic init --------------------------------

def init_params(key, *, vocab, max_pos, hidden, ffn, num_layers, length,
                num_heads, head_dim, fc_pad=128):
    wdt = jnp.bfloat16  # matmul operands in bf16 (MXU native); norms/biases in f32

    def nrm(k, shape, scale=0.02):
        return scale * jax.random.normal(k, shape)

    keys = jax.random.split(key, 4 + num_layers)
    attn_scale = 1.0 / math.sqrt(head_dim)

    # Pad fc weight/bias to 128 output lanes (lane-dense stores); sliced back in glue.
    fc_w = jnp.pad(nrm(keys[2], (hidden, length)), ((0, 0), (0, fc_pad - length)))

    # TODO(synk): pretrained SimCSE-RoBERTa checkpoint loading has no Pallas equivalent;
    # weights are synthetic and deterministic.
    # TODO(synk): real RoBERTa offsets position ids by padding_idx+1 based on the mask;
    # irrelevant for synthetic position embeddings.
    params = {
        "tok_emb": nrm(keys[0], (vocab, hidden)).astype(wdt),
        "pos_emb": nrm(keys[1], (max_pos, hidden)).astype(wdt),
        "emb_ln_g": jnp.ones((hidden,), jnp.float32),
        "emb_ln_b": jnp.zeros((hidden,), jnp.float32),
        "fc_w": fc_w.astype(wdt),
        "fc_b": jnp.zeros((fc_pad,), jnp.float32),
        "layers": [],
    }
    for li in range(num_layers):
        lk = jax.random.split(keys[4 + li], 6)
        # Attention 1/sqrt(head_dim) scale folded into the Q projection (and its bias).
        wq = nrm(lk[0], (hidden, hidden)) * attn_scale
        wk = nrm(lk[1], (hidden, hidden))
        wv = nrm(lk[2], (hidden, hidden))
        params["layers"].append({
            "w_qkv": jnp.concatenate([wq, wk, wv], axis=1).astype(wdt),   # (H, 3H)
            "b_qkv": jnp.zeros((3 * hidden,), jnp.float32),
            "wo": nrm(lk[3], (hidden, hidden)).astype(wdt),
            "bo": jnp.zeros((hidden,), jnp.float32),
            "ln1_g": jnp.ones((hidden,), jnp.float32),
            "ln1_b": jnp.zeros((hidden,), jnp.float32),
            "w1": nrm(lk[4], (hidden, ffn)).astype(wdt),
            "b1": jnp.zeros((ffn,), jnp.float32),
            "w2": nrm(lk[5], (ffn, hidden)).astype(wdt),
            "b2": jnp.zeros((hidden,), jnp.float32),
            "ln2_g": jnp.ones((hidden,), jnp.float32),
            "ln2_b": jnp.zeros((hidden,), jnp.float32),
        })
    return params


# ----------------------------------- main -----------------------------------------

if __name__ == "__main__":
    # Small synthetic config (RoBERTa-style): hidden=32, 2 heads, 2 layers, seq=8.
    B, S, H = 2, 8, 32
    NUM_HEADS, HEAD_DIM = 2, 16
    FFN, LAYERS = 64, 2
    VOCAB, MAX_POS = 100, 64
    LENGTH = 16   # output feature length of Simcsewrap.fc
    FC_PAD = 128  # lane-dense padded fc output width

    root = jax.random.PRNGKey(0)
    k_tok, k_param = jax.random.split(root)

    tokens = jax.random.randint(k_tok, (B, S), 0, VOCAB, dtype=jnp.int32)
    input_masks = jnp.array(
        [[1, 1, 1, 1, 1, 1, 1, 1],
         [1, 1, 1, 1, 1, 0, 0, 0]], dtype=jnp.float32)

    params = init_params(k_param, vocab=VOCAB, max_pos=MAX_POS, hidden=H,
                         ffn=FFN, num_layers=LAYERS, length=LENGTH,
                         num_heads=NUM_HEADS, head_dim=HEAD_DIM, fc_pad=FC_PAD)

    fwd = jax.jit(functools.partial(simcse_wrap_forward,
                                    num_heads=NUM_HEADS, head_dim=HEAD_DIM,
                                    length=LENGTH))
    feats = fwd(params, tokens, input_masks)
    jax.block_until_ready(feats)

    assert feats.shape == (B, LENGTH)
    assert bool(jnp.all(jnp.isfinite(feats)))
    assert bool(jnp.all(jnp.abs(feats) <= 1.0))  # tanh range
    print("KERNEL_OK")
</pallas_src>

<mosaic_0001>
module attributes {stable_mosaic.version = 11 : i64} {
  func.func @_layernorm_kernel(%arg0: i32, %arg1: memref<16x32xbf16, #tpu.memory_space<vmem>>, %arg2: memref<1x32xf32, #tpu.memory_space<vmem>>, %arg3: memref<1x32xf32, #tpu.memory_space<vmem>>, %arg4: memref<16x32xbf16, #tpu.memory_space<vmem>>) attributes {dimension_semantics = [#tpu.dimension_semantics<parallel>], iteration_bounds = array<i64: 1>, scalar_prefetch = 0 : i64, scratch_operands = 0 : i64, tpu.core_type = #tpu.core_type<tc>, window_params = [{transform_indices = @transform_0, window_bounds = array<i64: 16, 32>}, {pipeline_mode = #tpu.pipeline_mode<synchronous>, transform_indices = @transform_1, window_bounds = array<i64: 1, 32>}, {pipeline_mode = #tpu.pipeline_mode<synchronous>, transform_indices = @transform_2, window_bounds = array<i64: 1, 32>}, {transform_indices = @transform_3, window_bounds = array<i64: 16, 32>}]} {
    %c0 = arith.constant 0 : index
    %c0_0 = arith.constant 0 : index
    %0 = vector.load %arg1[%c0, %c0_0] : memref<16x32xbf16, #tpu.memory_space<vmem>>, vector<16x32xbf16>
    %1 = arith.extf %0 : vector<16x32xbf16> to vector<16x32xf32>
    %cst = arith.constant dense<0.000000e+00> : vector<16xf32>
    %2 = vector.multi_reduction <add>, %1, %cst [1] : vector<16x32xf32> to vector<16xf32>
    %3 = vector.shape_cast %2 : vector<16xf32> to vector<16x1xf32>
    %cst_1 = arith.constant 3.200000e+01 : f32
    %4 = vector.broadcast %cst_1 : f32 to vector<16x1xf32>
    %5 = arith.divf %3, %4 : vector<16x1xf32>
    %6 = vector.broadcast %5 : vector<16x1xf32> to vector<16x32xf32>
    %7 = arith.subf %1, %6 : vector<16x32xf32>
    %8 = arith.mulf %7, %7 : vector<16x32xf32>
    %cst_2 = arith.constant dense<0.000000e+00> : vector<16xf32>
    %9 = vector.multi_reduction <add>, %8, %cst_2 [1] : vector<16x32xf32> to vector<16xf32>
    %10 = vector.shape_cast %9 : vector<16xf32> to vector<16x1xf32>
    %cst_3 = arith.constant 3.200000e+01 : f32
    %11 = vector.broadcast %cst_3 : f32 to vector<16x1xf32>
    %12 = arith.divf %10, %11 : vector<16x1xf32>
    %13 = vector.broadcast %5 : vector<16x1xf32> to vector<16x32xf32>
    %14 = arith.subf %1, %13 : vector<16x32xf32>
    %cst_4 = arith.constant 9.99999974E-6 : f32
    %15 = vector.broadcast %cst_4 : f32 to vector<16x1xf32>
    %16 = arith.addf %12, %15 : vector<16x1xf32>
    %17 = math.rsqrt %16 : vector<16x1xf32>
    %18 = vector.broadcast %17 : vector<16x1xf32> to vector<16x32xf32>
    %19 = arith.mulf %14, %18 : vector<16x32xf32>
    %c0_5 = arith.constant 0 : index
    %c0_6 = arith.constant 0 : index
    %20 = vector.load %arg2[%c0_5, %c0_6] : memref<1x32xf32, #tpu.memory_space<vmem>>, vector<1x32xf32>
    %21 = vector.broadcast %20 : vector<1x32xf32> to vector<16x32xf32>
    %22 = arith.mulf %19, %21 : vector<16x32xf32>
    %c0_7 = arith.constant 0 : index
    %c0_8 = arith.constant 0 : index
    %23 = vector.load %arg3[%c0_7, %c0_8] : memref<1x32xf32, #tpu.memory_space<vmem>>, vector<1x32xf32>
    %24 = vector.broadcast %23 : vector<1x32xf32> to vector<16x32xf32>
    %25 = arith.addf %22, %24 : vector<16x32xf32>
    %26 = arith.truncf %25 : vector<16x32xf32> to vector<16x32xbf16>
    %c0_9 = arith.constant 0 : index
    %c0_10 = arith.constant 0 : index
    %27 = vector.load %arg4[%c0_9, %c0_10] : memref<16x32xbf16, #tpu.memory_space<vmem>>, vector<16x32xbf16>
    tpu.vector_store %arg4[%c0_9, %c0_10], %26 {strides = array<i32>} : memref<16x32xbf16, #tpu.memory_space<vmem>>, vector<16x32xbf16>,
    return
  }
  func.func @transform_0(%arg0: i32) -> (i32, i32) {
    %c0_i32 = arith.constant 0 : i32
    %c0_i32_0 = arith.constant 0 : i32
    return %arg0, %c0_i32 : i32, i32
  }
  func.func @transform_1(%arg0: i32) -> (i32, i32) {
    %c0_i32 = arith.constant 0 : i32
    %c0_i32_0 = arith.constant 0 : i32
    %c0_i32_1 = arith.constant 0 : i32
    return %c0_i32, %c0_i32_0 : i32, i32
  }
  func.func @transform_2(%arg0: i32) -> (i32, i32) {
    %c0_i32 = arith.constant 0 : i32
    %c0_i32_0 = arith.constant 0 : i32
    %c0_i32_1 = arith.constant 0 : i32
    return %c0_i32, %c0_i32_0 : i32, i32
  }
  func.func @transform_3(%arg0: i32) -> (i32, i32) {
    %c0_i32 = arith.constant 0 : i32
    %c0_i32_0 = arith.constant 0 : i32
    return %arg0, %c0_i32 : i32, i32
  }
}

module attributes {stable_mosaic.version = 11 : i64} {
  func.func @_matmul_bias_act_kernel(%arg0: i32, %arg1: i32, %arg2: i32, %arg3: memref<16x32xbf16, #tpu.memory_space<vmem>>, %arg4: memref<32x96xbf16, #tpu.memory_space<vmem>>, %arg5: memref<1x96xf32, #tpu.memory_space<vmem>>, %arg6: memref<16x96xbf16, #tpu.memory_space<vmem>>, %arg7: memref<16x96xf32, #tpu.memory_space<vmem>>) attributes {dimension_semantics = [#tpu.dimension_semantics<parallel>, #tpu.dimension_semantics<parallel>, #tpu.dimension_semantics<arbitrary>], iteration_bounds = array<i64: 1, 1, 1>, scalar_prefetch = 0 : i64, scratch_operands = 1 : i64, tpu.core_type = #tpu.core_type<tc>, window_params = [{transform_indices = @transform_0, window_bounds = array<i64: 16, 32>}, {transform_indices = @transform_1, window_bounds = array<i64: 32, 96>}, {transform_indices = @transform_2, window_bounds = array<i64: 1, 96>}, {transform_indices = @transform_3, window_bounds = array<i64: 16, 96>}]} {
    %c0_i32 = arith.constant 0 : i32
    %0 = arith.cmpi eq, %arg2, %c0_i32 : i32
    %1 = arith.extui %0 : i1 to i32
    %c0_i32_0 = arith.constant 0 : i32
    %2 = arith.cmpi ne, %1, %c0_i32_0 : i32
    scf.if %2 {
      %cst_10 = arith.constant 0.000000e+00 : f32
      %12 = vector.broadcast %cst_10 : f32 to vector<16x96xf32>
      %c0_11 = arith.constant 0 : index
      %c0_12 = arith.constant 0 : index
      %13 = vector.load %arg7[%c0_11, %c0_12] : memref<16x96xf32, #tpu.memory_space<vmem>>, vector<16x96xf32>
      tpu.vector_store %arg7[%c0_11, %c0_12], %12 {strides = array<i32>} : memref<16x96xf32, #tpu.memory_space<vmem>>, vector<16x96xf32>,
    } else {
    }
    %c0 = arith.constant 0 : index
    %c0_1 = arith.constant 0 : index
    %3 = vector.load %arg7[%c0, %c0_1] : memref<16x96xf32, #tpu.memory_space<vmem>>, vector<16x96xf32>
    %c0_2 = arith.constant 0 : index
    %c0_3 = arith.constant 0 : index
    %4 = vector.load %arg3[%c0_2, %c0_3] : memref<16x32xbf16, #tpu.memory_space<vmem>>, vector<16x32xbf16>
    %c0_4 = arith.constant 0 : index
    %c0_5 = arith.constant 0 : index
    %5 = vector.load %arg4[%c0_4, %c0_5] : memref<32x96xbf16, #tpu.memory_space<vmem>>, vector<32x96xbf16>
    %cst = arith.constant dense<0.000000e+00> : vector<16x96xf32>
    %6 = tpu.matmul %4, %5, %cst {dimension_numbers = #tpu.dot_dimension_numbers<[1], [0], [0], [1], [0, 0, 1, 1], [], []>} : vector<16x32xbf16>, vector<32x96xbf16>, vector<16x96xf32> -> vector<16x96xf32>
    %7 = arith.addf %3, %6 : vector<16x96xf32>
    %c0_6 = arith.constant 0 : index
    %c0_7 = arith.constant 0 : index
    %8 = vector.load %arg7[%c0_6, %c0_7] : memref<16x96xf32, #tpu.memory_space<vmem>>, vector<16x96xf32>
    tpu.vector_store %arg7[%c0_6, %c0_7], %7 {strides = array<i32>} : memref<16x96xf32, #tpu.memory_space<vmem>>, vector<16x96xf32>,
    %c0_i32_8 = arith.constant 0 : i32
    %9 = arith.cmpi eq, %arg2, %c0_i32_8 : i32
    %10 = arith.extui %9 : i1 to i32
    %c0_i32_9 = arith.constant 0 : i32
    %11 = arith.cmpi ne, %10, %c0_i32_9 : i32
    scf.if %11 {
      %c0_10 = arith.constant 0 : index
      %c0_11 = arith.constant 0 : index
      %12 = vector.load %arg7[%c0_10, %c0_11] : memref<16x96xf32, #tpu.memory_space<vmem>>, vector<16x96xf32>
      %c0_12 = arith.constant 0 : index
      %c0_13 = arith.constant 0 : index
      %13 = vector.load %arg5[%c0_12, %c0_13] : memref<1x96xf32, #tpu.memory_space<vmem>>, vector<1x96xf32>
      %14 = vector.broadcast %13 : vector<1x96xf32> to vector<16x96xf32>
      %15 = arith.addf %12, %14 : vector<16x96xf32>
      %16 = arith.truncf %15 : vector<16x96xf32> to vector<16x96xbf16>
      %c0_14 = arith.constant 0 : index
      %c0_15 = arith.constant 0 : index
      %17 = vector.load %arg6[%c0_14, %c0_15] : memref<16x96xbf16, #tpu.memory_space<vmem>>, vector<16x96xbf16>
      tpu.vector_store %arg6[%c0_14, %c0_15], %16 {strides = array<i32>} : memref<16x96xbf16, #tpu.memory_space<vmem>>, vector<16x96xbf16>,
    } else {
    }
    return
  }
  func.func @transform_0(%arg0: i32, %arg1: i32, %arg2: i32) -> (i32, i32) {
    %c0_i32 = arith.constant 0 : i32
    return %arg0, %arg2 : i32, i32
  }
  func.func @transform_1(%arg0: i32, %arg1: i32, %arg2: i32) -> (i32, i32) {
    %c0_i32 = arith.constant 0 : i32
    return %arg2, %arg1 : i32, i32
  }
  func.func @transform_2(%arg0: i32, %arg1: i32, %arg2: i32) -> (i32, i32) {
    %c0_i32 = arith.constant 0 : i32
    %c0_i32_0 = arith.constant 0 : i32
    return %c0_i32, %arg1 : i32, i32
  }
  func.func @transform_3(%arg0: i32, %arg1: i32, %arg2: i32) -> (i32, i32) {
    %c0_i32 = arith.constant 0 : i32
    return %arg0, %arg1 : i32, i32
  }
}

module attributes {stable_mosaic.version = 11 : i64} {
  func.func @_matmul_residual_ln_kernel(%arg0: i32, %arg1: memref<16x32xbf16, #tpu.memory_space<vmem>>, %arg2: memref<32x32xbf16, #tpu.memory_space<vmem>>, %arg3: memref<1x32xf32, #tpu.memory_space<vmem>>, %arg4: memref<16x32xbf16, #tpu.memory_space<vmem>>, %arg5: memref<1x32xf32, #tpu.memory_space<vmem>>, %arg6: memref<1x32xf32, #tpu.memory_space<vmem>>, %arg7: memref<16x32xbf16, #tpu.memory_space<vmem>>) attributes {dimension_semantics = [#tpu.dimension_semantics<parallel>], iteration_bounds = array<i64: 1>, scalar_prefetch = 0 : i64, scratch_operands = 0 : i64, tpu.core_type = #tpu.core_type<tc>, window_params = [{transform_indices = @transform_0, window_bounds = array<i64: 16, 32>}, {pipeline_mode = #tpu.pipeline_mode<synchronous>, transform_indices = @transform_1, window_bounds = array<i64: 32, 32>}, {pipeline_mode = #tpu.pipeline_mode<synchronous>, transform_indices = @transform_2, window_bounds = array<i64: 1, 32>}, {transform_indices = @transform_3, window_bounds = array<i64: 16, 32>}, {pipeline_mode = #tpu.pipeline_mode<synchronous>, transform_indices = @transform_4, window_bounds = array<i64: 1, 32>}, {pipeline_mode = #tpu.pipeline_mode<synchronous>, transform_indices = @transform_5, window_bounds = array<i64: 1, 32>}, {transform_indices = @transform_6, window_bounds = array<i64: 16, 32>}]} {
    %c0 = arith.constant 0 : index
    %c0_0 = arith.constant 0 : index
    %0 = vector.load %arg1[%c0, %c0_0] : memref<16x32xbf16, #tpu.memory_space<vmem>>, vector<16x32xbf16>
    %c0_1 = arith.constant 0 : index
    %c0_2 = arith.constant 0 : index
    %1 = vector.load %arg2[%c0_1, %c0_2] : memref<32x32xbf16, #tpu.memory_space<vmem>>, vector<32x32xbf16>
    %cst = arith.constant dense<0.000000e+00> : vector<16x32xf32>
    %2 = tpu.matmul %0, %1, %cst {dimension_numbers = #tpu.dot_dimension_numbers<[1], [0], [0], [1], [0, 0, 1, 1], [], []>} : vector<16x32xbf16>, vector<32x32xbf16>, vector<16x32xf32> -> vector<16x32xf32>
    %c0_3 = arith.constant 0 : index
    %c0_4 = arith.constant 0 : index
    %3 = vector.load %arg3[%c0_3, %c0_4] : memref<1x32xf32, #tpu.memory_space<vmem>>, vector<1x32xf32>
    %4 = vector.broadcast %3 : vector<1x32xf32> to vector<16x32xf32>
    %5 = arith.addf %2, %4 : vector<16x32xf32>
    %c0_5 = arith.constant 0 : index
    %c0_6 = arith.constant 0 : index
    %6 = vector.load %arg4[%c0_5, %c0_6] : memref<16x32xbf16, #tpu.memory_space<vmem>>, vector<16x32xbf16>
    %7 = arith.extf %6 : vector<16x32xbf16> to vector<16x32xf32>
    %8 = arith.addf %5, %7 : vector<16x32xf32>
    %cst_7 = arith.constant dense<0.000000e+00> : vector<16xf32>
    %9 = vector.multi_reduction <add>, %8, %cst_7 [1] : vector<16x32xf32> to vector<16xf32>
    %10 = vector.shape_cast %9 : vector<16xf32> to vector<16x1xf32>
    %cst_8 = arith.constant 3.200000e+01 : f32
    %11 = vector.broadcast %cst_8 : f32 to vector<16x1xf32>
    %12 = arith.divf %10, %11 : vector<16x1xf32>
    %13 = vector.broadcast %12 : vector<16x1xf32> to vector<16x32xf32>
    %14 = arith.subf %8, %13 : vector<16x32xf32>
    %15 = arith.mulf %14, %14 : vector<16x32xf32>
    %cst_9 = arith.constant dense<0.000000e+00> : vector<16xf32>
    %16 = vector.multi_reduction <add>, %15, %cst_9 [1] : vector<16x32xf32> to vector<16xf32>
    %17 = vector.shape_cast %16 : vector<16xf32> to vector<16x1xf32>
    %cst_10 = arith.constant 3.200000e+01 : f32
    %18 = vector.broadcast %cst_10 : f32 to vector<16x1xf32>
    %19 = arith.divf %17, %18 : vector<16x1xf32>
    %20 = vector.broadcast %12 : vector<16x1xf32> to vector<16x32xf32>
    %21 = arith.subf %8, %20 : vector<16x32xf32>
    %cst_11 = arith.constant 9.99999974E-6 : f32
    %22 = vector.broadcast %cst_11 : f32 to vector<16x1xf32>
    %23 = arith.addf %19, %22 : vector<16x1xf32>
    %24 = math.rsqrt %23 : vector<16x1xf32>
    %25 = vector.broadcast %24 : vector<16x1xf32> to vector<16x32xf32>
    %26 = arith.mulf %21, %25 : vector<16x32xf32>
    %c0_12 = arith.constant 0 : index
    %c0_13 = arith.constant 0 : index
    %27 = vector.load %arg5[%c0_12, %c0_13] : memref<1x32xf32, #tpu.memory_space<vmem>>, vector<1x32xf32>
    %28 = vector.broadcast %27 : vector<1x32xf32> to vector<16x32xf32>
    %29 = arith.mulf %26, %28 : vector<16x32xf32>
    %c0_14 = arith.constant 0 : index
    %c0_15 = arith.constant 0 : index
    %30 = vector.load %arg6[%c0_14, %c0_15] : memref<1x32xf32, #tpu.memory_space<vmem>>, vector<1x32xf32>
    %31 = vector.broadcast %30 : vector<1x32xf32> to vector<16x32xf32>
    %32 = arith.addf %29, %31 : vector<16x32xf32>
    %33 = arith.truncf %32 : vector<16x32xf32> to vector<16x32xbf16>
    %c0_16 = arith.constant 0 : index
    %c0_17 = arith.constant 0 : index
    %34 = vector.load %arg7[%c0_16, %c0_17] : memref<16x32xbf16, #tpu.memory_space<vmem>>, vector<16x32xbf16>
    tpu.vector_store %arg7[%c0_16, %c0_17], %33 {strides = array<i32>} : memref<16x32xbf16, #tpu.memory_space<vmem>>, vector<16x32xbf16>,
    return
  }
  func.func @transform_0(%arg0: i32) -> (i32, i32) {
    %c0_i32 = arith.constant 0 : i32
    %c0_i32_0 = arith.constant 0 : i32
    return %arg0, %c0_i32 : i32, i32
  }
  func.func @transform_1(%arg0: i32) -> (i32, i32) {
    %c0_i32 = arith.constant 0 : i32
    %c0_i32_0 = arith.constant 0 : i32
    %c0_i32_1 = arith.constant 0 : i32
    return %c0_i32, %c0_i32_0 : i32, i32
  }
  func.func @transform_2(%arg0: i32) -> (i32, i32) {
    %c0_i32 = arith.constant 0 : i32
    %c0_i32_0 = arith.constant 0 : i32
    %c0_i32_1 = arith.constant 0 : i32
    return %c0_i32, %c0_i32_0 : i32, i32
  }
  func.func @transform_3(%arg0: i32) -> (i32, i32) {
    %c0_i32 = arith.constant 0 : i32
    %c0_i32_0 = arith.constant 0 : i32
    return %arg0, %c0_i32 : i32, i32
  }
  func.func @transform_4(%arg0: i32) -> (i32, i32) {
    %c0_i32 = arith.constant 0 : i32
    %c0_i32_0 = arith.constant 0 : i32
    %c0_i32_1 = arith.constant 0 : i32
    return %c0_i32, %c0_i32_0 : i32, i32
  }
  func.func @transform_5(%arg0: i32) -> (i32, i32) {
    %c0_i32 = arith.constant 0 : i32
    %c0_i32_0 = arith.constant 0 : i32
    %c0_i32_1 = arith.constant 0 : i32
    return %c0_i32, %c0_i32_0 : i32, i32
  }
  func.func @transform_6(%arg0: i32) -> (i32, i32) {
    %c0_i32 = arith.constant 0 : i32
    %c0_i32_0 = arith.constant 0 : i32
    return %arg0, %c0_i32 : i32, i32
  }
}

module attributes {stable_mosaic.version = 11 : i64} {
  func.func @_attention_kernel(%arg0: i32, %arg1: memref<1x8x96xbf16, #tpu.memory_space<vmem>>, %arg2: memref<1x1x8xf32, #tpu.memory_space<vmem>>, %arg3: memref<1x8x32xbf16, #tpu.memory_space<vmem>>) attributes {dimension_semantics = [#tpu.dimension_semantics<parallel>], iteration_bounds = array<i64: 2>, scalar_prefetch = 0 : i64, scratch_operands = 0 : i64, tpu.core_type = #tpu.core_type<tc>, window_params = [{transform_indices = @transform_0, window_bounds = array<i64: 1, 8, 96>}, {transform_indices = @transform_1, window_bounds = array<i64: 1, 1, 8>}, {transform_indices = @transform_2, window_bounds = array<i64: 1, 8, 32>}]} {
    %c0 = arith.constant 0 : index
    %c0_0 = arith.constant 0 : index
    %c0_1 = arith.constant 0 : index
    %0 = vector.load %arg1[%c0, %c0_0, %c0_1] : memref<1x8x96xbf16, #tpu.memory_space<vmem>>, vector<1x8x96xbf16>
    %1 = vector.shape_cast %0 : vector<1x8x96xbf16> to vector<8x96xbf16>
    %c0_2 = arith.constant 0 : index
    %c0_3 = arith.constant 0 : index
    %c0_4 = arith.constant 0 : index
    %2 = vector.load %arg2[%c0_2, %c0_3, %c0_4] : memref<1x1x8xf32, #tpu.memory_space<vmem>>, vector<1x1x8xf32>
    %3 = vector.shape_cast %2 : vector<1x1x8xf32> to vector<1x8xf32>
    %4 = vector.extract_strided_slice %1 {offsets = [0, 0], sizes = [8, 16], strides = [1, 1]} : vector<8x96xbf16> to vector<8x16xbf16>
    %5 = vector.extract_strided_slice %1 {offsets = [0, 32], sizes = [8, 16], strides = [1, 1]} : vector<8x96xbf16> to vector<8x16xbf16>
    %6 = vector.extract_strided_slice %1 {offsets = [0, 64], sizes = [8, 16], strides = [1, 1]} : vector<8x96xbf16> to vector<8x16xbf16>
    %cst = arith.constant dense<0.000000e+00> : vector<8x8xf32>
    %7 = tpu.matmul %4, %5, %cst {dimension_numbers = #tpu.dot_dimension_numbers<[1], [1], [0], [0], [0, 0, 1, 0], [], []>} : vector<8x16xbf16>, vector<8x16xbf16>, vector<8x8xf32> -> vector<8x8xf32>
    %8 = vector.broadcast %3 : vector<1x8xf32> to vector<8x8xf32>
    %9 = arith.addf %7, %8 : vector<8x8xf32>
    %cst_5 = arith.constant dense<0xFF800000> : vector<8xf32>
    %10 = vector.multi_reduction <maximumf>, %9, %cst_5 [1] : vector<8x8xf32> to vector<8xf32>
    %11 = vector.shape_cast %10 : vector<8xf32> to vector<8x1xf32>
    %12 = vector.broadcast %11 : vector<8x1xf32> to vector<8x8xf32>
    %13 = arith.subf %9, %12 : vector<8x8xf32>
    %14 = math.exp %13 : vector<8x8xf32>
    %cst_6 = arith.constant dense<0.000000e+00> : vector<8xf32>
    %15 = vector.multi_reduction <add>, %14, %cst_6 [1] : vector<8x8xf32> to vector<8xf32>
    %16 = vector.shape_cast %15 : vector<8xf32> to vector<8x1xf32>
    %cst_7 = arith.constant 9.99999968E-21 : f32
    %17 = vector.broadcast %cst_7 : f32 to vector<8x1xf32>
    %18 = arith.maximumf %16, %17 : vector<8x1xf32>
    %19 = tpu.reciprocal %18 {approx = true} : vector<8x1xf32> -> vector<8x1xf32>
    %20 = vector.broadcast %19 : vector<8x1xf32> to vector<8x8xf32>
    %21 = arith.mulf %14, %20 : vector<8x8xf32>
    %22 = arith.truncf %21 : vector<8x8xf32> to vector<8x8xbf16>
    %cst_8 = arith.constant dense<0.000000e+00> : vector<8x16xf32>
    %23 = tpu.matmul %22, %6, %cst_8 {dimension_numbers = #tpu.dot_dimension_numbers<[1], [0], [0], [1], [0, 0, 1, 1], [], []>} : vector<8x8xbf16>, vector<8x16xbf16>, vector<8x16xf32> -> vector<8x16xf32>
    %24 = vector.extract_strided_slice %1 {offsets = [0, 16], sizes = [8, 16], strides = [1, 1]} : vector<8x96xbf16> to vector<8x16xbf16>
    %25 = vector.extract_strided_slice %1 {offsets = [0, 48], sizes = [8, 16], strides = [1, 1]} : vector<8x96xbf16> to vector<8x16xbf16>
    %26 = vector.extract_strided_slice %1 {offsets = [0, 80], sizes = [8, 16], strides = [1, 1]} : vector<8x96xbf16> to vector<8x16xbf16>
    %cst_9 = arith.constant dense<0.000000e+00> : vector<8x8xf32>
    %27 = tpu.matmul %24, %25, %cst_9 {dimension_numbers = #tpu.dot_dimension_numbers<[1], [1], [0], [0], [0, 0, 1, 0], [], []>} : vector<8x16xbf16>, vector<8x16xbf16>, vector<8x8xf32> -> vector<8x8xf32>
    %28 = vector.broadcast %3 : vector<1x8xf32> to vector<8x8xf32>
    %29 = arith.addf %27, %28 : vector<8x8xf32>
    %cst_10 = arith.constant dense<0xFF800000> : vector<8xf32>
    %30 = vector.multi_reduction <maximumf>, %29, %cst_10 [1] : vector<8x8xf32> to vector<8xf32>
    %31 = vector.shape_cast %30 : vector<8xf32> to vector<8x1xf32>
    %32 = vector.broadcast %31 : vector<8x1xf32> to vector<8x8xf32>
    %33 = arith.subf %29, %32 : vector<8x8xf32>
    %34 = math.exp %33 : vector<8x8xf32>
    %cst_11 = arith.constant dense<0.000000e+00> : vector<8xf32>
    %35 = vector.multi_reduction <add>, %34, %cst_11 [1] : vector<8x8xf32> to vector<8xf32>
    %36 = vector.shape_cast %35 : vector<8xf32> to vector<8x1xf32>
    %cst_12 = arith.constant 9.99999968E-21 : f32
    %37 = vector.broadcast %cst_12 : f32 to vector<8x1xf32>
    %38 = arith.maximumf %36, %37 : vector<8x1xf32>
    %39 = tpu.reciprocal %38 {approx = true} : vector<8x1xf32> -> vector<8x1xf32>
    %40 = vector.broadcast %39 : vector<8x1xf32> to vector<8x8xf32>
    %41 = arith.mulf %34, %40 : vector<8x8xf32>
    %42 = arith.truncf %41 : vector<8x8xf32> to vector<8x8xbf16>
    %cst_13 = arith.constant dense<0.000000e+00> : vector<8x16xf32>
    %43 = tpu.matmul %42, %26, %cst_13 {dimension_numbers = #tpu.dot_dimension_numbers<[1], [0], [0], [1], [0, 0, 1, 1], [], []>} : vector<8x8xbf16>, vector<8x16xbf16>, vector<8x16xf32> -> vector<8x16xf32>
    %44 = tpu.concatenate %23, %43 in 1 : vector<8x16xf32>, vector<8x16xf32> -> vector<8x32xf32>
    %45 = arith.truncf %44 : vector<8x32xf32> to vector<8x32xbf16>
    %c0_14 = arith.constant 0 : index
    %c0_15 = arith.constant 0 : index
    %c0_16 = arith.constant 0 : index
    %46 = vector.load %arg3[%c0_14, %c0_15, %c0_16] : memref<1x8x32xbf16, #tpu.memory_space<vmem>>, vector<1x8x32xbf16>
    %47 = vector.shape_cast %46 : vector<1x8x32xbf16> to vector<8x32xbf16>
    %48 = vector.shape_cast %45 : vector<8x32xbf16> to vector<1x8x32xbf16>
    tpu.vector_store %arg3[%c0_14, %c0_15, %c0_16], %48 {strides = array<i32>} : memref<1x8x32xbf16, #tpu.memory_space<vmem>>, vector<1x8x32xbf16>,
    return
  }
  func.func @transform_0(%arg0: i32) -> (i32, i32, i32) {
    %c0_i32 = arith.constant 0 : i32
    %c0_i32_0 = arith.constant 0 : i32
    %c0_i32_1 = arith.constant 0 : i32
    return %arg0, %c0_i32, %c0_i32_0 : i32, i32, i32
  }
  func.func @transform_1(%arg0: i32) -> (i32, i32, i32) {
    %c0_i32 = arith.constant 0 : i32
    %c0_i32_0 = arith.constant 0 : i32
    %c0_i32_1 = arith.constant 0 : i32
    return %arg0, %c0_i32, %c0_i32_0 : i32, i32, i32
  }
  func.func @transform_2(%arg0: i32) -> (i32, i32, i32) {
    %c0_i32 = arith.constant 0 : i32
    %c0_i32_0 = arith.constant 0 : i32
    %c0_i32_1 = arith.constant 0 : i32
    return %arg0, %c0_i32, %c0_i32_0 : i32, i32, i32
  }
}

module attributes {stable_mosaic.version = 11 : i64} {
  func.func @_matmul_bias_act_kernel(%arg0: i32, %arg1: i32, %arg2: i32, %arg3: memref<16x32xbf16, #tpu.memory_space<vmem>>, %arg4: memref<32x64xbf16, #tpu.memory_space<vmem>>, %arg5: memref<1x64xf32, #tpu.memory_space<vmem>>, %arg6: memref<16x64xbf16, #tpu.memory_space<vmem>>, %arg7: memref<16x64xf32, #tpu.memory_space<vmem>>) attributes {dimension_semantics = [#tpu.dimension_semantics<parallel>, #tpu.dimension_semantics<parallel>, #tpu.dimension_semantics<arbitrary>], iteration_bounds = array<i64: 1, 1, 1>, scalar_prefetch = 0 : i64, scratch_operands = 1 : i64, tpu.core_type = #tpu.core_type<tc>, window_params = [{transform_indices = @transform_0, window_bounds = array<i64: 16, 32>}, {transform_indices = @transform_1, window_bounds = array<i64: 32, 64>}, {transform_indices = @transform_2, window_bounds = array<i64: 1, 64>}, {transform_indices = @transform_3, window_bounds = array<i64: 16, 64>}]} {
    %c0_i32 = arith.constant 0 : i32
    %0 = arith.cmpi eq, %arg2, %c0_i32 : i32
    %1 = arith.extui %0 : i1 to i32
    %c0_i32_0 = arith.constant 0 : i32
    %2 = arith.cmpi ne, %1, %c0_i32_0 : i32
    scf.if %2 {
      %cst_10 = arith.constant 0.000000e+00 : f32
      %12 = vector.broadcast %cst_10 : f32 to vector<16x64xf32>
      %c0_11 = arith.constant 0 : index
      %c0_12 = arith.constant 0 : index
      %13 = vector.load %arg7[%c0_11, %c0_12] : memref<16x64xf32, #tpu.memory_space<vmem>>, vector<16x64xf32>
      tpu.vector_store %arg7[%c0_11, %c0_12], %12 {strides = array<i32>} : memref<16x64xf32, #tpu.memory_space<vmem>>, vector<16x64xf32>,
    } else {
    }
    %c0 = arith.constant 0 : index
    %c0_1 = arith.constant 0 : index
    %3 = vector.load %arg7[%c0, %c0_1] : memref<16x64xf32, #tpu.memory_space<vmem>>, vector<16x64xf32>
    %c0_2 = arith.constant 0 : index
    %c0_3 = arith.constant 0 : index
    %4 = vector.load %arg3[%c0_2, %c0_3] : memref<16x32xbf16, #tpu.memory_space<vmem>>, vector<16x32xbf16>
    %c0_4 = arith.constant 0 : index
    %c0_5 = arith.constant 0 : index
    %5 = vector.load %arg4[%c0_4, %c0_5] : memref<32x64xbf16, #tpu.memory_space<vmem>>, vector<32x64xbf16>
    %cst = arith.constant dense<0.000000e+00> : vector<16x64xf32>
    %6 = tpu.matmul %4, %5, %cst {dimension_numbers = #tpu.dot_dimension_numbers<[1], [0], [0], [1], [0, 0, 1, 1], [], []>} : vector<16x32xbf16>, vector<32x64xbf16>, vector<16x64xf32> -> vector<16x64xf32>
    %7 = arith.addf %3, %6 : vector<16x64xf32>
    %c0_6 = arith.constant 0 : index
    %c0_7 = arith.constant 0 : index
    %8 = vector.load %arg7[%c0_6, %c0_7] : memref<16x64xf32, #tpu.memory_space<vmem>>, vector<16x64xf32>
    tpu.vector_store %arg7[%c0_6, %c0_7], %7 {strides = array<i32>} : memref<16x64xf32, #tpu.memory_space<vmem>>, vector<16x64xf32>,
    %c0_i32_8 = arith.constant 0 : i32
    %9 = arith.cmpi eq, %arg2, %c0_i32_8 : i32
    %10 = arith.extui %9 : i1 to i32
    %c0_i32_9 = arith.constant 0 : i32
    %11 = arith.cmpi ne, %10, %c0_i32_9 : i32
    scf.if %11 {
      %c0_10 = arith.constant 0 : index
      %c0_11 = arith.constant 0 : index
      %12 = vector.load %arg7[%c0_10, %c0_11] : memref<16x64xf32, #tpu.memory_space<vmem>>, vector<16x64xf32>
      %c0_12 = arith.constant 0 : index
      %c0_13 = arith.constant 0 : index
      %13 = vector.load %arg5[%c0_12, %c0_13] : memref<1x64xf32, #tpu.memory_space<vmem>>, vector<1x64xf32>
      %14 = vector.broadcast %13 : vector<1x64xf32> to vector<16x64xf32>
      %15 = arith.addf %12, %14 : vector<16x64xf32>
      %16 = arith.mulf %15, %15 : vector<16x64xf32>
      %17 = arith.mulf %15, %16 : vector<16x64xf32>
      %cst_14 = arith.constant 4.471500e-02 : f32
      %18 = vector.broadcast %cst_14 : f32 to vector<16x64xf32>
      %19 = arith.mulf %18, %17 : vector<16x64xf32>
      %20 = arith.addf %15, %19 : vector<16x64xf32>
      %cst_15 = arith.constant 0.797884583 : f32
      %21 = vector.broadcast %cst_15 : f32 to vector<16x64xf32>
      %22 = arith.mulf %21, %20 : vector<16x64xf32>
      %23 = math.tanh %22 : vector<16x64xf32>
      %cst_16 = arith.constant 1.000000e+00 : f32
      %24 = vector.broadcast %cst_16 : f32 to vector<16x64xf32>
      %25 = arith.addf %24, %23 : vector<16x64xf32>
      %cst_17 = arith.constant 5.000000e-01 : f32
      %26 = vector.broadcast %cst_17 : f32 to vector<16x64xf32>
      %27 = arith.mulf %26, %25 : vector<16x64xf32>
      %28 = arith.mulf %15, %27 : vector<16x64xf32>
      %29 = arith.truncf %28 : vector<16x64xf32> to vector<16x64xbf16>
      %c0_18 = arith.constant 0 : index
      %c0_19 = arith.constant 0 : index
      %30 = vector.load %arg6[%c0_18, %c0_19] : memref<16x64xbf16, #tpu.memory_space<vmem>>, vector<16x64xbf16>
      tpu.vector_store %arg6[%c0_18, %c0_19], %29 {strides = array<i32>} : memref<16x64xbf16, #tpu.memory_space<vmem>>, vector<16x64xbf16>,
    } else {
    }
    return
  }
  func.func @transform_0(%arg0: i32, %arg1: i32, %arg2: i32) -> (i32, i32) {
    %c0_i32 = arith.constant 0 : i32
    return %arg0, %arg2 : i32, i32
  }
  func.func @transform_1(%arg0: i32, %arg1: i32, %arg2: i32) -> (i32, i32) {
    %c0_i32 = arith.constant 0 : i32
    return %arg2, %arg1 : i32, i32
  }
  func.func @transform_2(%arg0: i32, %arg1: i32, %arg2: i32) -> (i32, i32) {
    %c0_i32 = arith.constant 0 : i32
    %c0_i32_0 = arith.constant 0 : i32
    return %c0_i32, %arg1 : i32, i32
  }
  func.func @transform_3(%arg0: i32, %arg1: i32, %arg2: i32) -> (i32, i32) {
    %c0_i32 = arith.constant 0 : i32
    return %arg0, %arg1 : i32, i32
  }
}

module attributes {stable_mosaic.version = 11 : i64} {
  func.func @_matmul_residual_ln_kernel(%arg0: i32, %arg1: memref<16x64xbf16, #tpu.memory_space<vmem>>, %arg2: memref<64x32xbf16, #tpu.memory_space<vmem>>, %arg3: memref<1x32xf32, #tpu.memory_space<vmem>>, %arg4: memref<16x32xbf16, #tpu.memory_space<vmem>>, %arg5: memref<1x32xf32, #tpu.memory_space<vmem>>, %arg6: memref<1x32xf32, #tpu.memory_space<vmem>>, %arg7: memref<16x32xbf16, #tpu.memory_space<vmem>>) attributes {dimension_semantics = [#tpu.dimension_semantics<parallel>], iteration_bounds = array<i64: 1>, scalar_prefetch = 0 : i64, scratch_operands = 0 : i64, tpu.core_type = #tpu.core_type<tc>, window_params = [{transform_indices = @transform_0, window_bounds = array<i64: 16, 64>}, {pipeline_mode = #tpu.pipeline_mode<synchronous>, transform_indices = @transform_1, window_bounds = array<i64: 64, 32>}, {pipeline_mode = #tpu.pipeline_mode<synchronous>, transform_indices = @transform_2, window_bounds = array<i64: 1, 32>}, {transform_indices = @transform_3, window_bounds = array<i64: 16, 32>}, {pipeline_mode = #tpu.pipeline_mode<synchronous>, transform_indices = @transform_4, window_bounds = array<i64: 1, 32>}, {pipeline_mode = #tpu.pipeline_mode<synchronous>, transform_indices = @transform_5, window_bounds = array<i64: 1, 32>}, {transform_indices = @transform_6, window_bounds = array<i64: 16, 32>}]} {
    %c0 = arith.constant 0 : index
    %c0_0 = arith.constant 0 : index
    %0 = vector.load %arg1[%c0, %c0_0] : memref<16x64xbf16, #tpu.memory_space<vmem>>, vector<16x64xbf16>
    %c0_1 = arith.constant 0 : index
    %c0_2 = arith.constant 0 : index
    %1 = vector.load %arg2[%c0_1, %c0_2] : memref<64x32xbf16, #tpu.memory_space<vmem>>, vector<64x32xbf16>
    %cst = arith.constant dense<0.000000e+00> : vector<16x32xf32>
    %2 = tpu.matmul %0, %1, %cst {dimension_numbers = #tpu.dot_dimension_numbers<[1], [0], [0], [1], [0, 0, 1, 1], [], []>} : vector<16x64xbf16>, vector<64x32xbf16>, vector<16x32xf32> -> vector<16x32xf32>
    %c0_3 = arith.constant 0 : index
    %c0_4 = arith.constant 0 : index
    %3 = vector.load %arg3[%c0_3, %c0_4] : memref<1x32xf32, #tpu.memory_space<vmem>>, vector<1x32xf32>
    %4 = vector.broadcast %3 : vector<1x32xf32> to vector<16x32xf32>
    %5 = arith.addf %2, %4 : vector<16x32xf32>
    %c0_5 = arith.constant 0 : index
    %c0_6 = arith.constant 0 : index
    %6 = vector.load %arg4[%c0_5, %c0_6] : memref<16x32xbf16, #tpu.memory_space<vmem>>, vector<16x32xbf16>
    %7 = arith.extf %6 : vector<16x32xbf16> to vector<16x32xf32>
    %8 = arith.addf %5, %7 : vector<16x32xf32>
    %cst_7 = arith.constant dense<0.000000e+00> : vector<16xf32>
    %9 = vector.multi_reduction <add>, %8, %cst_7 [1] : vector<16x32xf32> to vector<16xf32>
    %10 = vector.shape_cast %9 : vector<16xf32> to vector<16x1xf32>
    %cst_8 = arith.constant 3.200000e+01 : f32
    %11 = vector.broadcast %cst_8 : f32 to vector<16x1xf32>
    %12 = arith.divf %10, %11 : vector<16x1xf32>
    %13 = vector.broadcast %12 : vector<16x1xf32> to vector<16x32xf32>
    %14 = arith.subf %8, %13 : vector<16x32xf32>
    %15 = arith.mulf %14, %14 : vector<16x32xf32>
    %cst_9 = arith.constant dense<0.000000e+00> : vector<16xf32>
    %16 = vector.multi_reduction <add>, %15, %cst_9 [1] : vector<16x32xf32> to vector<16xf32>
    %17 = vector.shape_cast %16 : vector<16xf32> to vector<16x1xf32>
    %cst_10 = arith.constant 3.200000e+01 : f32
    %18 = vector.broadcast %cst_10 : f32 to vector<16x1xf32>
    %19 = arith.divf %17, %18 : vector<16x1xf32>
    %20 = vector.broadcast %12 : vector<16x1xf32> to vector<16x32xf32>
    %21 = arith.subf %8, %20 : vector<16x32xf32>
    %cst_11 = arith.constant 9.99999974E-6 : f32
    %22 = vector.broadcast %cst_11 : f32 to vector<16x1xf32>
    %23 = arith.addf %19, %22 : vector<16x1xf32>
    %24 = math.rsqrt %23 : vector<16x1xf32>
    %25 = vector.broadcast %24 : vector<16x1xf32> to vector<16x32xf32>
    %26 = arith.mulf %21, %25 : vector<16x32xf32>
    %c0_12 = arith.constant 0 : index
    %c0_13 = arith.constant 0 : index
    %27 = vector.load %arg5[%c0_12, %c0_13] : memref<1x32xf32, #tpu.memory_space<vmem>>, vector<1x32xf32>
    %28 = vector.broadcast %27 : vector<1x32xf32> to vector<16x32xf32>
    %29 = arith.mulf %26, %28 : vector<16x32xf32>
    %c0_14 = arith.constant 0 : index
    %c0_15 = arith.constant 0 : index
    %30 = vector.load %arg6[%c0_14, %c0_15] : memref<1x32xf32, #tpu.memory_space<vmem>>, vector<1x32xf32>
    %31 = vector.broadcast %30 : vector<1x32xf32> to vector<16x32xf32>
    %32 = arith.addf %29, %31 : vector<16x32xf32>
    %33 = arith.truncf %32 : vector<16x32xf32> to vector<16x32xbf16>
    %c0_16 = arith.constant 0 : index
    %c0_17 = arith.constant 0 : index
    %34 = vector.load %arg7[%c0_16, %c0_17] : memref<16x32xbf16, #tpu.memory_space<vmem>>, vector<16x32xbf16>
    tpu.vector_store %arg7[%c0_16, %c0_17], %33 {strides = array<i32>} : memref<16x32xbf16, #tpu.memory_space<vmem>>, vector<16x32xbf16>,
    return
  }
  func.func @transform_0(%arg0: i32) -> (i32, i32) {
    %c0_i32 = arith.constant 0 : i32
    %c0_i32_0 = arith.constant 0 : i32
    return %arg0, %c0_i32 : i32, i32
  }
  func.func @transform_1(%arg0: i32) -> (i32, i32) {
    %c0_i32 = arith.constant 0 : i32
    %c0_i32_0 = arith.constant 0 : i32
    %c0_i32_1 = arith.constant 0 : i32
    return %c0_i32, %c0_i32_0 : i32, i32
  }
  func.func @transform_2(%arg0: i32) -> (i32, i32) {
    %c0_i32 = arith.constant 0 : i32
    %c0_i32_0 = arith.constant 0 : i32
    %c0_i32_1 = arith.constant 0 : i32
    return %c0_i32, %c0_i32_0 : i32, i32
  }
  func.func @transform_3(%arg0: i32) -> (i32, i32) {
    %c0_i32 = arith.constant 0 : i32
    %c0_i32_0 = arith.constant 0 : i32
    return %arg0, %c0_i32 : i32, i32
  }
  func.func @transform_4(%arg0: i32) -> (i32, i32) {
    %c0_i32 = arith.constant 0 : i32
    %c0_i32_0 = arith.constant 0 : i32
    %c0_i32_1 = arith.constant 0 : i32
    return %c0_i32, %c0_i32_0 : i32, i32
  }
  func.func @transform_5(%arg0: i32) -> (i32, i32) {
    %c0_i32 = arith.constant 0 : i32
    %c0_i32_0 = arith.constant 0 : i32
    %c0_i32_1 = arith.constant 0 : i32
    return %c0_i32, %c0_i32_0 : i32, i32
  }
  func.func @transform_6(%arg0: i32) -> (i32, i32) {
    %c0_i32 = arith.constant 0 : i32
    %c0_i32_0 = arith.constant 0 : i32
    return %arg0, %c0_i32 : i32, i32
  }
}

module attributes {stable_mosaic.version = 11 : i64} {
  func.func @_matmul_bias_act_kernel(%arg0: i32, %arg1: i32, %arg2: i32, %arg3: memref<2x32xbf16, #tpu.memory_space<vmem>>, %arg4: memref<32x128xbf16, #tpu.memory_space<vmem>>, %arg5: memref<1x128xf32, #tpu.memory_space<vmem>>, %arg6: memref<2x128xf32, #tpu.memory_space<vmem>>, %arg7: memref<2x128xf32, #tpu.memory_space<vmem>>) attributes {dimension_semantics = [#tpu.dimension_semantics<parallel>, #tpu.dimension_semantics<parallel>, #tpu.dimension_semantics<arbitrary>], iteration_bounds = array<i64: 1, 1, 1>, scalar_prefetch = 0 : i64, scratch_operands = 1 : i64, tpu.core_type = #tpu.core_type<tc>, window_params = [{transform_indices = @transform_0, window_bounds = array<i64: 2, 32>}, {transform_indices = @transform_1, window_bounds = array<i64: 32, 128>}, {transform_indices = @transform_2, window_bounds = array<i64: 1, 128>}, {transform_indices = @transform_3, window_bounds = array<i64: 2, 128>}]} {
    %c0_i32 = arith.constant 0 : i32
    %0 = arith.cmpi eq, %arg2, %c0_i32 : i32
    %1 = arith.extui %0 : i1 to i32
    %c0_i32_0 = arith.constant 0 : i32
    %2 = arith.cmpi ne, %1, %c0_i32_0 : i32
    scf.if %2 {
      %cst_10 = arith.constant 0.000000e+00 : f32
      %12 = vector.broadcast %cst_10 : f32 to vector<2x128xf32>
      %c0_11 = arith.constant 0 : index
      %c0_12 = arith.constant 0 : index
      %13 = vector.load %arg7[%c0_11, %c0_12] : memref<2x128xf32, #tpu.memory_space<vmem>>, vector<2x128xf32>
      tpu.vector_store %arg7[%c0_11, %c0_12], %12 {strides = array<i32>} : memref<2x128xf32, #tpu.memory_space<vmem>>, vector<2x128xf32>,
    } else {
    }
    %c0 = arith.constant 0 : index
    %c0_1 = arith.constant 0 : index
    %3 = vector.load %arg7[%c0, %c0_1] : memref<2x128xf32, #tpu.memory_space<vmem>>, vector<2x128xf32>
    %c0_2 = arith.constant 0 : index
    %c0_3 = arith.constant 0 : index
    %4 = vector.load %arg3[%c0_2, %c0_3] : memref<2x32xbf16, #tpu.memory_space<vmem>>, vector<2x32xbf16>
    %c0_4 = arith.constant 0 : index
    %c0_5 = arith.constant 0 : index
    %5 = vector.load %arg4[%c0_4, %c0_5] : memref<32x128xbf16, #tpu.memory_space<vmem>>, vector<32x128xbf16>
    %cst = arith.constant dense<0.000000e+00> : vector<2x128xf32>
    %6 = tpu.matmul %4, %5, %cst {dimension_numbers = #tpu.dot_dimension_numbers<[1], [0], [0], [1], [0, 0, 1, 1], [], []>} : vector<2x32xbf16>, vector<32x128xbf16>, vector<2x128xf32> -> vector<2x128xf32>
    %7 = arith.addf %3, %6 : vector<2x128xf32>
    %c0_6 = arith.constant 0 : index
    %c0_7 = arith.constant 0 : index
    %8 = vector.load %arg7[%c0_6, %c0_7] : memref<2x128xf32, #tpu.memory_space<vmem>>, vector<2x128xf32>
    tpu.vector_store %arg7[%c0_6, %c0_7], %7 {strides = array<i32>} : memref<2x128xf32, #tpu.memory_space<vmem>>, vector<2x128xf32>,
    %c0_i32_8 = arith.constant 0 : i32
    %9 = arith.cmpi eq, %arg2, %c0_i32_8 : i32
    %10 = arith.extui %9 : i1 to i32
    %c0_i32_9 = arith.constant 0 : i32
    %11 = arith.cmpi ne, %10, %c0_i32_9 : i32
    scf.if %11 {
      %c0_10 = arith.constant 0 : index
      %c0_11 = arith.constant 0 : index
      %12 = vector.load %arg7[%c0_10, %c0_11] : memref<2x128xf32, #tpu.memory_space<vmem>>, vector<2x128xf32>
      %c0_12 = arith.constant 0 : index
      %c0_13 = arith.constant 0 : index
      %13 = vector.load %arg5[%c0_12, %c0_13] : memref<1x128xf32, #tpu.memory_space<vmem>>, vector<1x128xf32>
      %14 = vector.broadcast %13 : vector<1x128xf32> to vector<2x128xf32>
      %15 = arith.addf %12, %14 : vector<2x128xf32>
      %16 = math.tanh %15 : vector<2x128xf32>
      %c0_14 = arith.constant 0 : index
      %c0_15 = arith.constant 0 : index
      %17 = vector.load %arg6[%c0_14, %c0_15] : memref<2x128xf32, #tpu.memory_space<vmem>>, vector<2x128xf32>
      tpu.vector_store %arg6[%c0_14, %c0_15], %16 {strides = array<i32>} : memref<2x128xf32, #tpu.memory_space<vmem>>, vector<2x128xf32>,
    } else {
    }
    return
  }
  func.func @transform_0(%arg0: i32, %arg1: i32, %arg2: i32) -> (i32, i32) {
    %c0_i32 = arith.constant 0 : i32
    return %arg0, %arg2 : i32, i32
  }
  func.func @transform_1(%arg0: i32, %arg1: i32, %arg2: i32) -> (i32, i32) {
    %c0_i32 = arith.constant 0 : i32
    return %arg2, %arg1 : i32, i32
  }
  func.func @transform_2(%arg0: i32, %arg1: i32, %arg2: i32) -> (i32, i32) {
    %c0_i32 = arith.constant 0 : i32
    %c0_i32_0 = arith.constant 0 : i32
    return %c0_i32, %arg1 : i32, i32
  }
  func.func @transform_3(%arg0: i32, %arg1: i32, %arg2: i32) -> (i32, i32) {
    %c0_i32 = arith.constant 0 : i32
    return %arg0, %arg1 : i32, i32
  }
}

</mosaic_0001>

<bundles_post_ra>
// kernel: simcse_wrap_forward.12
= control target key start
LH: loop header
LB: loop body
LE: loop exit
PB: predicated region body
PF: predicated region fallthrough
CT: control target
= control target key end

     0   :  { %vm18_vm0 = vcmask 261120   ;;  %vm72_vm1 = vcmask 257024   ;;  %s132_s0 = inlined_call_operand.vmem [shape: bf16[16,32], index: 0, kind: input, shape index: {}]   ;;  %s133_s1 = inlined_call_operand.vmem [shape: f32[1,32], index: 1, kind: input, shape index: {}]   ;;  %s134_s2 = inlined_call_operand.vmem [shape: f32[1,32], index: 2, kind: input, shape index: {}]   ;;  %s135_s3 = inlined_call_operand.vmem [shape: bf16[16,32], index: 3, kind: output, shape index: {}]  }
   0x1   :  { %v86_v0 = vld [vmem:[%s132_s0] sm:$0xff]  }
   0x2   :  { %v87_v1 = vunpack.c.l.bf16 %v86_v0  ;;  %v88_v2 = vunpack.c.h.bf16 %v86_v0  ;;  %v79_v22 = vld [vmem:[%s133_s1] ss:$0 sm:$0xff] }
   0x3   :  { %v80_v24 = vld [vmem:[%s134_s2] ss:$0 sm:$0xff] }
   0x4   :  { %v19_v3 = vsel %vm18_vm0, %v87_v1, 0.0  ;;  %v22_v4 = vsel %vm18_vm0, %v88_v2, 0.0 }
   0x5   :  { %20 = vadd.xlane.f32.xlu0 %v19_v3 }
   0x9   :  { %23 = vadd.xlane.f32.xlu0 %v22_v4 }
  0x92   :  { %v21_v5 = vpop.xlane.xlu0 %20 }
  0x93   :  { %v26_v6 = vmul.f32 0.03125, %v21_v5 }
  0x95   :  { %v28_v7 = vsub.f32 %v87_v1, %v26_v6 }
  0x96   :  { %v24_v8 = vpop.xlane.xlu0 %23 }
  0x97   :  { %v27_v9 = vmul.f32 0.03125, %v24_v8  ;;  %v30_v10 = vmul.f32 %v28_v7, %v28_v7 }
  0x99   :  { %v29_v11 = vsub.f32 %v88_v2, %v27_v9  ;;  %v32_v12 = vsel %vm18_vm0, %v30_v10, 0.0 }
  0x9a   :  { %33 = vadd.xlane.f32.xlu1 %v32_v12 }
  0x9b   :  { %v31_v13 = vmul.f32 %v29_v11, %v29_v11 }
  0x9d   :  { %v35_v14 = vsel %vm18_vm0, %v31_v13, 0.0 }
  0x9e   :  { %36 = vadd.xlane.f32.xlu1 %v35_v14 }
 0x127   :  { %v34_v15 = vpop.xlane.xlu1 %33 }
 0x128   :  { %v38_v16 = vmul.f32 0.03125, %v34_v15 }
 0x12a   :  { %v40_v17 = vadd.f32 1e-05, %v38_v16 }
 0x12b   :  { %v37_v18 = vpop.xlane.xlu1 %36 }
 0x12c   :  { %89 = vrsqrt.f32 %v40_v17  ;;  %v39_v19 = vmul.f32 0.03125, %v37_v18 }
 0x12e   :  { %v41_v20 = vadd.f32 1e-05, %v39_v19 }
 0x130   :  { %91 = vrsqrt.f32 %v41_v20 }
 0x136   :  { %v90_v21 = vpop.eup %89 }
 0x137   :  { %v44_v23 = vmul.f32 %v90_v21, %v28_v7 }
 0x139   :  { %v53_v25 = vmul.f32 %v79_v22, %v44_v23 }
 0x13a   :  { %v92_v26 = vpop.eup %91 }
 0x13b   :  { %v62_v27 = vadd.f32 %v80_v24, %v53_v25  ;;  %v45_v28 = vmul.f32 %v92_v26, %v29_v11 }
 0x13d   :  { %v83_v29 = vpack.c.bf16 %v62_v27, %v62_v27  ;;  %v54_v30 = vmul.f32 %v79_v22, %v45_v28 }
 0x13f   :  { %73 = vst.msk [vmem:[%s135_s3] sm:$0xf] %vm72_vm1, %v83_v29  ;;  %v63_v31 = vadd.f32 %v80_v24, %v54_v30 }
 0x141   :  { %v84_v32 = vpack.c.bf16 %v63_v31, %v63_v31 }
 0x143   :  { %74 = vst.msk [vmem:[%s135_s3 + $0x4] sm:$0xf] %vm72_vm1, %v84_v32 }

// kernel: simcse_wrap_forward.15
= control target key start
LH: loop header
LB: loop body
LE: loop exit
PB: predicated region body
PF: predicated region fallthrough
CT: control target
= control target key end

     0   :  { %v200_v0 = vmov 0.0   ;;  %vm201_vm0 = vmmov 0   ;;  %vm54_vm1 = vcmask 261120   ;;  %vm158_vm2 = vcmask 257024   ;;  %s269_s1 = inlined_call_operand.vmem [shape: bf16[32,32], index: 1, kind: input, shape index: {}]   ;;  %s270_s0 = inlined_call_operand.vmem [shape: bf16[16,32], index: 0, kind: input, shape index: {}]   ;;  %s271_s3 = inlined_call_operand.vmem [shape: bf16[16,32], index: 3, kind: input, shape index: {}]   ;;  %s272_s2 = inlined_call_operand.vmem [shape: f32[1,32], index: 2, kind: input, shape index: {}]   ;;  %s273_s4 = inlined_call_operand.vmem [shape: f32[1,32], index: 4, kind: input, shape index: {}]   ;;  %s274_s5 = inlined_call_operand.vmem [shape: f32[1,32], index: 5, kind: input, shape index: {}]   ;;  %s275_s6 = inlined_call_operand.vmem [shape: bf16[16,32], index: 6, kind: output, shape index: {}]  }
   0x1   :  { %183 = vmatprep.subr.bf16.mxu0 %v200_v0  ;;  %v193_v1 = vld [vmem:[%s269_s1] sm:$0xff]   ;;  %187 = vmatprep.mubr.msk.bf16.mxu0 %vm201_vm0, %v200_v0  ;;  %v194_v2 = vld [vmem:[%s269_s1 + $0x8] sm:$0xff]  }
   0x2   :  { %184 = vmatpush3.bf16.msra.mxu0 %v193_v1  ;;  %v195_v3 = vld [vmem:[%s270_s0] sm:$0xff]  }
   0x3   :  { %185 = vmatprep.subr.bf16.mxu0 %v200_v0  ;;  %v177_v4 = vld [vmem:[%s271_s3] sm:$0xff]  }
   0x4   :  { %v165_v5 = vld [vmem:[%s272_s2] ss:$0 sm:$0xff]  ;;  %v178_v6 = vunpack.c.l.bf16 %v177_v4  ;;  %v179_v10 = vunpack.c.h.bf16 %v177_v4 }
   0x5   :  { %v170_v35 = vld [vmem:[%s273_s4] ss:$0 sm:$0xff] }
   0x6   :  { %186 = vmatpush3.bf16.msra.mxu0 %v194_v2  ;;  %v171_v37 = vld [vmem:[%s274_s5] ss:$0 sm:$0xff] }
   0x9   :  { %188 = vmatmul.mubr.msk.bf16.vlgmr.msra.gmra.mrb[0].mxu0 %vm54_vm1, %v195_v3 }
  0xdc   :  { %v92_v7 = vpop.f32.mrb[0].mxu0 }
  0xdd   :  { %v93_v8 = vadd.f32 %v165_v5, %v92_v7  ;;  %v189_v9 = vpop.f32.mrb[1].mxu0 }
  0xde   :  { %v95_v11 = vpop.f32.mrb[2].mxu0 }
  0xdf   :  { %v96_v12 = vadd.f32 %v165_v5, %v95_v11  ;;  %v190_v13 = vpop.f32.mrb[3].mxu0  ;;  %v103_v14 = vadd.f32 %v178_v6, %v93_v8 }
  0xe1   :  { %v105_v15 = vsel %vm54_vm1, %v103_v14, 0.0  ;;  %v104_v16 = vadd.f32 %v179_v10, %v96_v12 }
  0xe2   :  { %106 = vadd.xlane.f32.xlu0 %v105_v15 }
  0xe3   :  { %v108_v17 = vsel %vm54_vm1, %v104_v16, 0.0 }
  0xe6   :  { %109 = vadd.xlane.f32.xlu0 %v108_v17 }
 0x16f   :  { %v107_v18 = vpop.xlane.xlu0 %106 }
 0x170   :  { %v112_v19 = vmul.f32 0.03125, %v107_v18 }
 0x172   :  { %v114_v20 = vsub.f32 %v103_v14, %v112_v19 }
 0x173   :  { %v110_v21 = vpop.xlane.xlu0 %109 }
 0x174   :  { %v113_v22 = vmul.f32 0.03125, %v110_v21  ;;  %v116_v23 = vmul.f32 %v114_v20, %v114_v20 }
 0x176   :  { %v115_v24 = vsub.f32 %v104_v16, %v113_v22  ;;  %v118_v25 = vsel %vm54_vm1, %v116_v23, 0.0 }
 0x177   :  { %119 = vadd.xlane.f32.xlu1 %v118_v25 }
 0x178   :  { %v117_v26 = vmul.f32 %v115_v24, %v115_v24 }
 0x17a   :  { %v121_v27 = vsel %vm54_vm1, %v117_v26, 0.0 }
 0x17b   :  { %122 = vadd.xlane.f32.xlu1 %v121_v27 }
 0x204   :  { %v120_v28 = vpop.xlane.xlu1 %119 }
 0x205   :  { %v124_v29 = vmul.f32 0.03125, %v120_v28 }
 0x207   :  { %v126_v30 = vadd.f32 1e-05, %v124_v29 }
 0x208   :  { %v123_v31 = vpop.xlane.xlu1 %122 }
 0x209   :  { %196 = vrsqrt.f32 %v126_v30  ;;  %v125_v32 = vmul.f32 0.03125, %v123_v31 }
 0x20b   :  { %v127_v33 = vadd.f32 1e-05, %v125_v32 }
 0x20d   :  { %198 = vrsqrt.f32 %v127_v33 }
 0x213   :  { %v197_v34 = vpop.eup %196 }
 0x214   :  { %v130_v36 = vmul.f32 %v197_v34, %v114_v20 }
 0x216   :  { %v139_v38 = vmul.f32 %v170_v35, %v130_v36 }
 0x217   :  { %v199_v39 = vpop.eup %198 }
 0x218   :  { %v148_v40 = vadd.f32 %v171_v37, %v139_v38  ;;  %v131_v41 = vmul.f32 %v199_v39, %v115_v24 }
 0x21a   :  { %v174_v42 = vpack.c.bf16 %v148_v40, %v148_v40  ;;  %v140_v43 = vmul.f32 %v170_v35, %v131_v41 }
 0x21c   :  { %159 = vst.msk [vmem:[%s275_s6] sm:$0xf] %vm158_vm2, %v174_v42  ;;  %v149_v44 = vadd.f32 %v171_v37, %v140_v43 }
 0x21e   :  { %v175_v45 = vpack.c.bf16 %v149_v44, %v149_v44 }
 0x220   :  { %160 = vst.msk [vmem:[%s275_s6 + $0x4] sm:$0xf] %vm158_vm2, %v175_v45 }

// kernel: simcse_wrap_forward.13
= control target key start
LH: loop header
LB: loop body
LE: loop exit
PB: predicated region body
PF: predicated region fallthrough
CT: control target
= control target key end

     0   :  { %vm19_vm0 = vcmask 785408   ;;  %v151_v0 = vmov 0.0   ;;  %vm152_vm1 = vmmov 0   ;;  %vm47_vm2 = vcmask 261120   ;;  %s195_s1 = inlined_call_operand.vmem [shape: bf16[32,96], index: 1, kind: input, shape index: {}]   ;;  %s196_s0 = inlined_call_operand.vmem [shape: bf16[16,32], index: 0, kind: input, shape index: {}]   ;;  %s197_s2 = inlined_call_operand.vmem [shape: f32[1,96], index: 2, kind: input, shape index: {}]   ;;  %s198_s3 = inlined_call_operand.vmem [shape: bf16[16,96], index: 3, kind: output, shape index: {}]  }
   0x1   :  { %138 = vmatprep.subr.bf16.mxu0 %v151_v0  ;;  %v148_v1 = vld [vmem:[%s195_s1] sm:$0xff]   ;;  %142 = vmatprep.mubr.msk.bf16.mxu0 %vm152_vm1, %v151_v0  ;;  %20 = vst.msk [vmem:[#allocation2] sm:$0xff] %vm19_vm0, %v151_v0  ;;  %21 = vst.msk [vmem:[#allocation2 + $0x8] sm:$0xff] %vm19_vm0, %v151_v0  ;;  %v149_v2 = vld [vmem:[%s195_s1 + $0x8] sm:$0xff]   ;;  %vm119_vm3 = vcmask 781312  }
   0x2   :  { %139 = vmatpush3.bf16.msra.mxu0 %v148_v1  ;;  %v150_v3 = vld [vmem:[%s196_s0] sm:$0xff]  }
   0x3   :  { %140 = vmatprep.subr.bf16.mxu0 %v151_v0  ;;  %v130_v12 = vld [vmem:[%s197_s2] ss:$0 sm:$0xff] }
   0x6   :  { %141 = vmatpush3.bf16.msra.mxu0 %v149_v2 }
   0x8   :  { %v22_v4 = vld [vmem:[#allocation2] sm:$0xff]  ;;  %v23_v6 = vld [vmem:[#allocation2 + $0x8] sm:$0xff] }
   0x9   :  { %143 = vmatmul.mubr.msk.bf16.vlgmr.msra.gmra.mrb[0].mxu0 %vm47_vm2, %v150_v3 }
  0xdc   :  { %v85_v5 = vpop.f32.mrb[0].mxu0 }
  0xdd   :  { %v92_v7 = vadd.f32 %v85_v5, %v22_v4  ;;  %v144_v8 = vpop.f32.mrb[1].mxu0 }
  0xde   :  { %v88_v9 = vpop.f32.mrb[2].mxu0 }
  0xdf   :  { %95 = vst.msk [vmem:[#allocation2] sm:$0xff] %vm19_vm0, %v92_v7  ;;  %v93_v10 = vadd.f32 %v88_v9, %v23_v6  ;;  %v145_v11 = vpop.f32.mrb[3].mxu0 }
  0xe1   :  { %96 = vst.msk [vmem:[#allocation2 + $0x8] sm:$0xff] %vm19_vm0, %v93_v10 }
  0xe6   :  { %v100_v13 = vld [vmem:[#allocation2] sm:$0xff] }
  0xe7   :  { %v109_v14 = vadd.f32 %v130_v12, %v100_v13 }
  0xe8   :  { %v101_v15 = vld [vmem:[#allocation2 + $0x8] sm:$0xff] }
  0xe9   :  { %v133_v16 = vpack.c.bf16 %v109_v14, %v109_v14  ;;  %v110_v17 = vadd.f32 %v130_v12, %v101_v15 }
  0xeb   :  { %120 = vst.msk [vmem:[%s198_s3] sm:$0xf] %vm119_vm3, %v133_v16  ;;  %v134_v18 = vpack.c.bf16 %v110_v17, %v110_v17 }
  0xed   :  { %121 = vst.msk [vmem:[%s198_s3 + $0x4] sm:$0xf] %vm119_vm3, %v134_v18 }

// kernel: simcse_wrap_forward.14
= control target key start
LH: loop header
LB: loop body
LE: loop exit
PB: predicated region body
PF: predicated region fallthrough
CT: control target
= control target key end

     0   :  { %s561_s9 = smov 0   ;;  %s613_s0 = inlined_call_operand.vmem [shape: bf16[2,8,96], index: 0, kind: input, shape index: {}]   ;;  %s614_s1 = inlined_call_operand.vmem [shape: f32[2,1,8], index: 1, kind: input, shape index: {}]   ;;  %s615_s2 = inlined_call_operand.vmem [shape: bf16[2,8,32], index: 2, kind: output, shape index: {}]  }
   0x1 LB: > { %s458_s10 = sadd.s32 4294967295, %s536_s9   ;;  %p462_p0 = scmp.ge.s32.totalorder %s536_s9, 1  ;;  %s536_s9 = sphi %s561_s9, %s12_s9  }
   0x2   : > { %p119_p1 = scmp.lt.s32.totalorder %s536_s9, 3 }
   0x4   : > { %p120_p2 = pnand %p462_p0, %p119_p1 }
   0x5   : > { %p142_p3 = scmp.lt.s32.totalorder (!%p120_p2), %s458_s10, 1  ;;  %v538_v0 = vmov (!%p120_p2), 0.0   ;;  %vm539_vm0 = vmmov (!%p120_p2), 0   ;;  %s540_s15 = smov (!%p120_p2), 96   ;;  %vm167_vm1 = vcmask (!%p120_p2), 130048   ;;  %vm214_vm2 = vcmask (!%p120_p2), 64512  }
   0x6   : > { %123 = sbr.rel (%p120_p2) target bundleno = 1545 (0x609), region = 28  ;;  %481 = vmatprep.subr.bf16.mxu0 (!%p120_p2), %v538_v0  ;;  %483 = vmatprep.mubr.msk.bf16.mxu0 (!%p120_p2), %vm539_vm0, %v538_v0  ;;  %s541_s16 = smov (!%p120_p2), 64   ;;  %vm233_vm3 = vcmask (!%p120_p2), 1043456   ;;  %vm394_vm4 = vcmask (!%p120_p2), 257024  }
   0x7   : > { %487 = vmatprep.subr.bf16.mxu1 (!%p120_p2), %v538_v0  ;;  %489 = vmatprep.mubr.msk.bf16.mxu1 (!%p120_p2), %vm539_vm0, %v538_v0  ;;  %s542_s20 = smov (!%p120_p2), 80   ;;  %s543_s21 = smov (!%p120_p2), 112  }
   0x8   : > { %s544_s22 = smov (!%p120_p2), 48   ;;  %s545_s23 = smov (!%p120_p2), 16  }
   0xd   : > { %s617_s10 = smov (!%p142_p3, %s458_s10), 1 }
   0xe   : > { %s463_s11 = sshll.u32 %s617_s10, 2  ;;  %s148_s19 = scalar_lea.vmem %s614_s1, %s617_s10 }
   0xf   : > { %s145_s14 = scalar_lea.vmem %s613_s0, %s463_s11  ;;  %v465_v5 = vld [vmem:[%s148_s19] ss:$0 sm:$0xff]  ;;  %s152_s26 = scalar_lea.vmem %s615_s2, %s463_s11 }
  0x10   : > { %v154_v1 = vld [vmem:[%s145_s14] sm:$0xf] }
  0x11   : > { %v579_v2 = vcombine.low %v154_v1, %v154_v1 }
  0x13   : > { %165 = vrot.lane.b32.xlu0 %v579_v2, %s540_s15  ;;  %228 = vrot.lane.b32.xlu1 %v579_v2, %s541_s16 }
  0x85   : > { %v166_v3 = vpop.permute.xlu0 %165  ;;  %v229_v12 = vpop.permute.xlu1 %228 }
  0x86   : > { %v172_v4 = vsel %vm167_vm1, %v166_v3, 0  ;;  %v235_v13 = vsel %vm233_vm3, %v229_v12, 0 }
  0x87   : > { %482 = vmatpush3.bf16.xpose.msra.mxu0 %v172_v4  ;;  %488 = vmatpush3.bf16.msra.mxu1 %v235_v13 }
  0x88   : > { %499 = vmatprep.subr.bf16.mxu0 %v538_v0  ;;  %493 = vmatprep.subr.bf16.mxu1 %v538_v0 }
  0x8e   : > { %484 = vmatmul.mubr.msk.bf16.vlgmr.msra.gmra.mrb[0].mxu0 %vm167_vm1, %v154_v1 }
  0x8f   : > { %501 = vmatprep.mubr.msk.bf16.mxu0 %vm539_vm0, %v538_v0 }
 0x161   : > { %v208_v6 = vpop.f32.mrb[0].mxu0 }
 0x162   : > { %v209_v7 = vadd.f32 %v465_v5, %v208_v6  ;;  %v485_v8 = vpop.f32.mrb[1].mxu0 }
 0x163   : > { %v211_v9 = vpop.f32.mrb[2].mxu0 }
 0x164   : > { %v486_v10 = vpop.f32.mrb[3].mxu0  ;;  %v215_v11 = vsel %vm214_vm2, %v209_v7, -inf }
 0x165   : > { %216 = vmax.xlane.f32.xlu0 %v215_v11 }
 0x1f2   : > { %v217_v14 = vpop.xlane.xlu0 %216 }
 0x1f3   : > { %v218_v15 = vsub.f32 %v209_v7, %v217_v14 }
 0x1f5   : > { %v219_v16 = vmul.f32 1.442695, %v218_v15 }
 0x1f7   : > { %522 = vpow2.f32 %v219_v16 }
 0x201   : > { %v523_v17 = vpop.eup %522 }
 0x202   : > { %v221_v18 = vsel %vm214_vm2, %v523_v17, 0.0 }
 0x203   : > { %222 = vadd.xlane.f32.xlu1 %v221_v18 }
 0x214   : > { %279 = vrot.lane.b32.xlu1 %v579_v2, %s542_s20 }
 0x218   : > { %277 = vrot.lane.b32.xlu1 %v579_v2, %s543_s21 }
 0x290   : > { %v223_v19 = vpop.xlane.xlu1 %222 }
 0x291   : > { %v224_v20 = vmax.f32 %v223_v19, 1e-20 }
 0x293   : > { %524 = vrcp.f32 %v224_v20 }
 0x294   : > { %v280_v22 = vpop.permute.xlu1 %279 }
 0x295   : > { %v285_v24 = vsel %vm167_vm1, %v280_v22, 0 }
 0x298   : > { %v278_v26 = vpop.permute.xlu1 %277 }
 0x29d   : > { %v525_v21 = vpop.eup %524 }
 0x29e   : > { %v226_v23 = vmul.f32 %v525_v21, %v523_v17 }
 0x2a0   : > { %v227_v25 = vpack.c.bf16 %v226_v23, %v226_v23 }
 0x2a2   : > { %490 = vmatmul.mubr.msk.bf16.vlgmr.msra.gmra.mrb[0].mxu1 %vm214_vm2, %v227_v25 }
 0x2a3   : > { %494 = vmatpush3.bf16.xpose.msra.mxu1 %v285_v24  ;;  %495 = vmatprep.mubr.msk.bf16.mxu1 %vm539_vm0, %v538_v0 }
 0x2aa   : > { %496 = vmatmul.mubr.msk.bf16.vlgmr.msra.gmra.mrb[4].mxu1 %vm167_vm1, %v278_v26 }
 0x375   : > { %v271_v27 = vpop.f32.mrb[0].mxu1 }
 0x376   : > { %v491_v28 = vpop.f32.mrb[1].mxu1 }
 0x377   : > { %v274_v29 = vpop.f32.mrb[2].mxu1 }
 0x378   : > { %v492_v30 = vpop.f32.mrb[3].mxu1 }
 0x37d   : > { %v321_v31 = vpop.f32.mrb[4].mxu1 }
 0x37e   : > { %v322_v32 = vadd.f32 %v465_v5, %v321_v31  ;;  %v497_v33 = vpop.f32.mrb[5].mxu1 }
 0x37f   : > { %v324_v34 = vpop.f32.mrb[6].mxu1 }
 0x380   : > { %v498_v35 = vpop.f32.mrb[7].mxu1  ;;  %v327_v36 = vsel %vm214_vm2, %v322_v32, -inf }
 0x381   : > { %328 = vmax.xlane.f32.xlu1 %v327_v36 }
 0x40e   : > { %v329_v37 = vpop.xlane.xlu1 %328 }
 0x40f   : > { %v330_v38 = vsub.f32 %v322_v32, %v329_v37 }
 0x411   : > { %v331_v39 = vmul.f32 1.442695, %v330_v38 }
 0x413   : > { %526 = vpow2.f32 %v331_v39 }
 0x41d   : > { %v527_v40 = vpop.eup %526 }
 0x41e   : > { %v333_v41 = vsel %vm214_vm2, %v527_v40, 0.0 }
 0x41f   : > { %334 = vadd.xlane.f32.xlu0 %v333_v41 }
 0x435   : > { %340 = vrot.lane.b32.xlu0 %v579_v2, %s544_s22 }
 0x4ac   : > { %v335_v42 = vpop.xlane.xlu0 %334 }
 0x4ad   : > { %v336_v43 = vmax.f32 %v335_v42, 1e-20 }
 0x4af   : > { %528 = vrcp.f32 %v336_v43 }
 0x4b0   : > { %v341_v44 = vpop.permute.xlu0 %340 }
 0x4b1   : > { %v346_v45 = vsel %vm233_vm3, %v341_v44, 0 }
 0x4b2   : > { %500 = vmatpush3.bf16.msra.mxu0 %v346_v45 }
 0x4b9   : > { %v529_v46 = vpop.eup %528 }
 0x4ba   : > { %v338_v47 = vmul.f32 %v529_v46, %v527_v40 }
 0x4bc   : > { %v339_v48 = vpack.c.bf16 %v338_v47, %v338_v47 }
 0x4be   : > { %502 = vmatmul.mubr.msk.bf16.vlgmr.msra.gmra.mrb[4].mxu0 %vm214_vm2, %v339_v48 }
 0x591   : > { %v382_v49 = vpop.f32.mrb[4].mxu0 }
 0x592   : > { %389 = vrot.lane.b32.xlu0 %v382_v49, %s545_s23  ;;  %v503_v50 = vpop.f32.mrb[5].mxu0 }
 0x593   : > { %v385_v51 = vpop.f32.mrb[6].mxu0 }
 0x594   : > { %v504_v52 = vpop.f32.mrb[7].mxu0 }
 0x604   : > { %v390_v53 = vpop.permute.xlu0 %389 }
 0x605   : > { %v392_v54 = vsel %vm167_vm1, %v271_v27, %v390_v53 }
 0x606   : > { %v393_v55 = vpack.c.bf16 %v392_v54, %v392_v54 }
 0x608   : > { %395 = vst.msk [vmem:[%s152_s26] sm:$0xf] %vm394_vm4, %v393_v55 }
 0x609 PF: > { %s12_s9 = sadd.s32 1, %s536_s9  }
 0x60a   : > { %p9_p4 = scmp.ge.s32.totalorder %s12_s9, 4  }
 0x60c   :  { %11 = sbr.rel (!%p9_p4) target bundleno = 1 (0x1), region = 61 }

// kernel: simcse_wrap_forward.16
= control target key start
LH: loop header
LB: loop body
LE: loop exit
PB: predicated region body
PF: predicated region fallthrough
CT: control target
= control target key end

     0   :  { %vm19_vm0 = vcmask 523264   ;;  %v173_v0 = vmov 0.0   ;;  %vm174_vm1 = vmmov 0   ;;  %vm47_vm2 = vcmask 261120   ;;  %s217_s1 = inlined_call_operand.vmem [shape: bf16[32,64], index: 1, kind: input, shape index: {}]   ;;  %s218_s0 = inlined_call_operand.vmem [shape: bf16[16,32], index: 0, kind: input, shape index: {}]   ;;  %s219_s2 = inlined_call_operand.vmem [shape: f32[1,64], index: 2, kind: input, shape index: {}]   ;;  %s220_s3 = inlined_call_operand.vmem [shape: bf16[16,64], index: 3, kind: output, shape index: {}]  }
   0x1   :  { %156 = vmatprep.subr.bf16.mxu0 %v173_v0  ;;  %v166_v1 = vld [vmem:[%s217_s1] sm:$0xff]   ;;  %160 = vmatprep.mubr.msk.bf16.mxu0 %vm174_vm1, %v173_v0  ;;  %20 = vst.msk [vmem:[#allocation2] sm:$0xff] %vm19_vm0, %v173_v0  ;;  %21 = vst.msk [vmem:[#allocation2 + $0x8] sm:$0xff] %vm19_vm0, %v173_v0  ;;  %v167_v2 = vld [vmem:[%s217_s1 + $0x8] sm:$0xff]   ;;  %vm137_vm3 = vcmask 519168  }
   0x2   :  { %157 = vmatpush3.bf16.msra.mxu0 %v166_v1  ;;  %v168_v3 = vld [vmem:[%s218_s0] sm:$0xff]  }
   0x3   :  { %158 = vmatprep.subr.bf16.mxu0 %v173_v0  ;;  %v148_v12 = vld [vmem:[%s219_s2] ss:$0 sm:$0xff] }
   0x6   :  { %159 = vmatpush3.bf16.msra.mxu0 %v167_v2 }
   0x8   :  { %v22_v4 = vld [vmem:[#allocation2] sm:$0xff]  ;;  %v23_v6 = vld [vmem:[#allocation2 + $0x8] sm:$0xff] }
   0x9   :  { %161 = vmatmul.mubr.msk.bf16.vlgmr.msra.gmra.mrb[0].mxu0 %vm47_vm2, %v168_v3 }
  0xdc   :  { %v85_v5 = vpop.f32.mrb[0].mxu0 }
  0xdd   :  { %v92_v7 = vadd.f32 %v85_v5, %v22_v4  ;;  %v162_v8 = vpop.f32.mrb[1].mxu0 }
  0xde   :  { %v88_v9 = vpop.f32.mrb[2].mxu0 }
  0xdf   :  { %95 = vst.msk [vmem:[#allocation2] sm:$0xff] %vm19_vm0, %v92_v7  ;;  %v93_v10 = vadd.f32 %v88_v9, %v23_v6  ;;  %v163_v11 = vpop.f32.mrb[3].mxu0 }
  0xe1   :  { %96 = vst.msk [vmem:[#allocation2 + $0x8] sm:$0xff] %vm19_vm0, %v93_v10 }
  0xe6   :  { %v100_v13 = vld [vmem:[#allocation2] sm:$0xff] }
  0xe7   :  { %v109_v14 = vadd.f32 %v148_v12, %v100_v13 }
  0xe8   :  { %v101_v15 = vld [vmem:[#allocation2 + $0x8] sm:$0xff] }
  0xe9   :  { %v111_v16 = vmul.f32 %v109_v14, %v109_v14  ;;  %v110_v17 = vadd.f32 %v148_v12, %v101_v15 }
  0xeb   :  { %v113_v18 = vmul.f32 %v111_v16, %v109_v14  ;;  %v112_v19 = vmul.f32 %v110_v17, %v110_v17 }
  0xed   :  { %v115_v20 = vmul.f32 0.044715, %v113_v18  ;;  %v114_v21 = vmul.f32 %v112_v19, %v110_v17 }
  0xef   :  { %v117_v22 = vadd.f32 %v115_v20, %v109_v14  ;;  %v116_v23 = vmul.f32 0.044715, %v114_v21 }
  0xf1   :  { %v119_v24 = vmul.f32 0.7978846, %v117_v22  ;;  %v118_v25 = vadd.f32 %v116_v23, %v110_v17 }
  0xf3   :  { %169 = vtanh.f32 %v119_v24  ;;  %v120_v26 = vmul.f32 0.7978846, %v118_v25 }
  0xf5   :  { %171 = vtanh.f32 %v120_v26 }
  0xfd   :  { %v170_v27 = vpop.eup %169 }
  0xfe   :  { %v123_v28 = vadd.f32 1.0, %v170_v27 }
  0xff   :  { %v172_v29 = vpop.eup %171 }
 0x100   :  { %v125_v30 = vmul.f32 0.5, %v123_v28  ;;  %v124_v31 = vadd.f32 1.0, %v172_v29 }
 0x102   :  { %v127_v32 = vmul.f32 %v125_v30, %v109_v14  ;;  %v126_v33 = vmul.f32 0.5, %v124_v31 }
 0x104   :  { %v151_v34 = vpack.c.bf16 %v127_v32, %v127_v32  ;;  %v128_v35 = vmul.f32 %v126_v33, %v110_v17 }
 0x106   :  { %138 = vst.msk [vmem:[%s220_s3] sm:$0xf] %vm137_vm3, %v151_v34  ;;  %v152_v36 = vpack.c.bf16 %v128_v35, %v128_v35 }
 0x108   :  { %139 = vst.msk [vmem:[%s220_s3 + $0x4] sm:$0xf] %vm137_vm3, %v152_v36 }

// kernel: simcse_wrap_forward.17
= control target key start
LH: loop header
LB: loop body
LE: loop exit
PB: predicated region body
PF: predicated region fallthrough
CT: control target
= control target key end

     0   :  { %v227_v0 = vmov 0.0   ;;  %vm228_vm0 = vmmov 0   ;;  %vm70_vm1 = vcmask 523264   ;;  %vm121_vm2 = vcmask 261120   ;;  %s301_s1 = inlined_call_operand.vmem [shape: bf16[64,32], index: 1, kind: input, shape index: {}]   ;;  %s302_s0 = inlined_call_operand.vmem [shape: bf16[16,64], index: 0, kind: input, shape index: {}]   ;;  %s303_s3 = inlined_call_operand.vmem [shape: bf16[16,32], index: 3, kind: input, shape index: {}]   ;;  %s304_s2 = inlined_call_operand.vmem [shape: f32[1,32], index: 2, kind: input, shape index: {}]   ;;  %s305_s4 = inlined_call_operand.vmem [shape: f32[1,32], index: 4, kind: input, shape index: {}]   ;;  %s306_s5 = inlined_call_operand.vmem [shape: f32[1,32], index: 5, kind: input, shape index: {}]   ;;  %s307_s6 = inlined_call_operand.vmem [shape: bf16[16,32], index: 6, kind: output, shape index: {}]  }
   0x1   :  { %204 = vmatprep.subr.bf16.mxu0 %v227_v0  ;;  %v218_v1 = vld [vmem:[%s301_s1] sm:$0xff]   ;;  %212 = vmatprep.mubr.msk.bf16.mxu0 %vm228_vm0, %v227_v0  ;;  %v219_v2 = vld [vmem:[%s301_s1 + $0x8] sm:$0xff]   ;;  %v220_v3 = vld [vmem:[%s301_s1 + $0x10] sm:$0xff]   ;;  %vm175_vm3 = vcmask 257024  }
   0x2   :  { %205 = vmatpush3.bf16.msra.mxu0 %v218_v1  ;;  %v221_v4 = vld [vmem:[%s301_s1 + $0x18] sm:$0xff]   ;;  %v222_v5 = vld [vmem:[%s302_s0] sm:$0xff]  }
   0x3   :  { %206 = vmatprep.subr.bf16.mxu0 %v227_v0  ;;  %v196_v6 = vld [vmem:[%s303_s3] sm:$0xff]  }
   0x4   :  { %v182_v7 = vld [vmem:[%s304_s2] ss:$0 sm:$0xff]  ;;  %v197_v8 = vunpack.c.l.bf16 %v196_v6  ;;  %v198_v12 = vunpack.c.h.bf16 %v196_v6 }
   0x5   :  { %v189_v37 = vld [vmem:[%s305_s4] ss:$0 sm:$0xff] }
   0x6   :  { %207 = vmatpush3.bf16.msra.mxu0 %v219_v2  ;;  %v190_v39 = vld [vmem:[%s306_s5] ss:$0 sm:$0xff] }
   0x7   :  { %208 = vmatprep.subr.bf16.mxu0 %v227_v0 }
   0xa   :  { %209 = vmatpush3.bf16.msra.mxu0 %v220_v3 }
   0xb   :  { %210 = vmatprep.subr.bf16.mxu0 %v227_v0 }
   0xe   :  { %211 = vmatpush3.bf16.msra.mxu0 %v221_v4 }
  0x11   :  { %213 = vmatmul.mubr.msk.bf16.vlgmr.msra.gmra.mrb[0].mxu0 %vm70_vm1, %v222_v5 }
  0xe4   :  { %v108_v9 = vpop.f32.mrb[0].mxu0 }
  0xe5   :  { %v109_v10 = vadd.f32 %v182_v7, %v108_v9  ;;  %v214_v11 = vpop.f32.mrb[1].mxu0 }
  0xe6   :  { %v111_v13 = vpop.f32.mrb[2].mxu0 }
  0xe7   :  { %v112_v14 = vadd.f32 %v182_v7, %v111_v13  ;;  %v215_v15 = vpop.f32.mrb[3].mxu0  ;;  %v119_v16 = vadd.f32 %v197_v8, %v109_v10 }
  0xe9   :  { %v122_v17 = vsel %vm121_vm2, %v119_v16, 0.0  ;;  %v120_v18 = vadd.f32 %v198_v12, %v112_v14 }
  0xea   :  { %123 = vadd.xlane.f32.xlu0 %v122_v17 }
  0xeb   :  { %v125_v19 = vsel %vm121_vm2, %v120_v18, 0.0 }
  0xee   :  { %126 = vadd.xlane.f32.xlu0 %v125_v19 }
 0x177   :  { %v124_v20 = vpop.xlane.xlu0 %123 }
 0x178   :  { %v129_v21 = vmul.f32 0.03125, %v124_v20 }
 0x17a   :  { %v131_v22 = vsub.f32 %v119_v16, %v129_v21 }
 0x17b   :  { %v127_v23 = vpop.xlane.xlu0 %126 }
 0x17c   :  { %v130_v24 = vmul.f32 0.03125, %v127_v23  ;;  %v133_v25 = vmul.f32 %v131_v22, %v131_v22 }
 0x17e   :  { %v132_v26 = vsub.f32 %v120_v18, %v130_v24  ;;  %v135_v27 = vsel %vm121_vm2, %v133_v25, 0.0 }
 0x17f   :  { %136 = vadd.xlane.f32.xlu1 %v135_v27 }
 0x180   :  { %v134_v28 = vmul.f32 %v132_v26, %v132_v26 }
 0x182   :  { %v138_v29 = vsel %vm121_vm2, %v134_v28, 0.0 }
 0x183   :  { %139 = vadd.xlane.f32.xlu1 %v138_v29 }
 0x20c   :  { %v137_v30 = vpop.xlane.xlu1 %136 }
 0x20d   :  { %v141_v31 = vmul.f32 0.03125, %v137_v30 }
 0x20f   :  { %v143_v32 = vadd.f32 1e-05, %v141_v31 }
 0x210   :  { %v140_v33 = vpop.xlane.xlu1 %139 }
 0x211   :  { %223 = vrsqrt.f32 %v143_v32  ;;  %v142_v34 = vmul.f32 0.03125, %v140_v33 }
 0x213   :  { %v144_v35 = vadd.f32 1e-05, %v142_v34 }
 0x215   :  { %225 = vrsqrt.f32 %v144_v35 }
 0x21b   :  { %v224_v36 = vpop.eup %223 }
 0x21c   :  { %v147_v38 = vmul.f32 %v224_v36, %v131_v22 }
 0x21e   :  { %v156_v40 = vmul.f32 %v189_v37, %v147_v38 }
 0x21f   :  { %v226_v41 = vpop.eup %225 }
 0x220   :  { %v165_v42 = vadd.f32 %v190_v39, %v156_v40  ;;  %v148_v43 = vmul.f32 %v226_v41, %v132_v26 }
 0x222   :  { %v193_v44 = vpack.c.bf16 %v165_v42, %v165_v42  ;;  %v157_v45 = vmul.f32 %v189_v37, %v148_v43 }
 0x224   :  { %176 = vst.msk [vmem:[%s307_s6] sm:$0xf] %vm175_vm3, %v193_v44  ;;  %v166_v46 = vadd.f32 %v190_v39, %v157_v45 }
 0x226   :  { %v194_v47 = vpack.c.bf16 %v166_v46, %v166_v46 }
 0x228   :  { %177 = vst.msk [vmem:[%s307_s6 + $0x4] sm:$0xf] %vm175_vm3, %v194_v47 }

// kernel: simcse_wrap_forward.23
= control target key start
LH: loop header
LB: loop body
LE: loop exit
PB: predicated region body
PF: predicated region fallthrough
CT: control target
= control target key end

     0   :  { %v159_v1 = vmov 0.0   ;;  %vm160_vm0 = vmmov 0   ;;  %s206_s0 = inlined_call_operand.vmem [shape: bf16[2,32], index: 0, kind: input, shape index: {}]   ;;  %s207_s1 = inlined_call_operand.vmem [shape: bf16[32,128], index: 1, kind: input, shape index: {}]   ;;  %s208_s2 = inlined_call_operand.vmem [shape: f32[1,128], index: 2, kind: input, shape index: {}]   ;;  %s209_s3 = inlined_call_operand.hbm [shape: f32[2,128], index: 3, kind: output, shape index: {}]  }
   0x1   :  { %v131_v0 = vld [vmem:[%s207_s1] sm:$0xff]   ;;  %120 = vmatprep.subr.bf16.mxu0 %v159_v1  ;;  %20 = vst [vmem:[#allocation2] sm:$0x3] %v159_v1  ;;  %v132_v2 = vld [vmem:[%s207_s1 + $0x8] sm:$0xff]   ;;  %124 = vmatprep.mubr.msk.bf16.mxu0 %vm160_vm0, %v159_v1 }
   0x2   :  { %121 = vmatpush3.bf16.msra.mxu0 %v131_v0 }
   0x3   :  { %8 = vsyncpa [#allocation4], 0  ;;  %122 = vmatprep.subr.bf16.mxu0 %v159_v1  ;;  %v22_v3 = vld [vmem:[%s206_s0] sm:$0x1]  ;;  %vm39_vm1 = vcmask 261120   ;;  %s161_s19 = smov [#allocation3]  }
   0x4   :  { %v116_v10 = vld [vmem:[%s208_s2] ss:$0 sm:$0xff]  ;;  %s105_s20 = sshll.u32 %s161_s19, 4  ;;  %s106_s20 = int_to_ptr.vmem [resolvable:$true] %s105_s20 }
   0x5   :  { %s135_s0 = scalar_lea.vmem %s106_s20, 32  ;;  %p140_p1 = scmp.lt.s32.totalorder %s106_s20, %s106_s20 }
   0x6   :  { %123 = vmatpush3.bf16.msra.mxu0 %v132_v2  ;;  %p136_p0 = scmp.ne.s32.totalorder %s106_s20, %s135_s0  ;;  %p141_p2 = scmp.lt.s32.totalorder %s135_s0, %s135_s0 }
   0x8   :  { %v21_v4 = vld [vmem:[#allocation2] sm:$0x3]  ;;  %p142_p3 = por %p141_p2, %p140_p1 }
   0x9   :  { %125 = vmatmul.mubr.msk.bf16.vlgmr.msra.gmra.mrb[0].mxu0 %vm39_vm1, %v22_v3 }
   0xa   :  { %p143_p4 = pnand %p142_p3, %p136_p0 }
  0xdc   :  { %v77_v5 = vpop.f32.mrb[0].mxu0 }
  0xdd   :  { %v83_v6 = vadd.f32 %v77_v5, %v21_v4  ;;  %v126_v7 = vpop.f32.mrb[1].mxu0 }
  0xde   :  { %v80_v8 = vpop.f32.mrb[2].mxu0 }
  0xdf   :  { %84 = vst [vmem:[#allocation2] sm:$0x3] %v83_v6  ;;  %v127_v9 = vpop.f32.mrb[3].mxu0 }
  0xe6   :  { %v88_v11 = vld [vmem:[#allocation2] sm:$0x3] }
  0xe7   :  { %v96_v12 = vadd.f32 %v116_v10, %v88_v11 }
  0xe9   :  { %133 = vtanh.f32 %v96_v12 }
  0xf3   :  { %v134_v13 = vpop.eup %133 }
  0xf4   :  { %98 = vst [vmem:[#allocation3] sm:$0x3] %v134_v13 }
  0xf5   :  { %146 = shalt.err (!%p143_p4)
}
  0xf6   :  { %s147_s23 = scalar_lea.hbm %s209_s3, 32 }
  0xf7   :  { %p148_p5 = scmp.ne.s32.totalorder %s209_s3, %s147_s23  ;;  %p151_p6 = scmp.lt.u32.totalorder %s147_s23, %s209_s3 }
  0xf9   :  { %p153_p7 = pnand %p151_p6, %p148_p5 }
  0xfb   :  { %156 = shalt.err (!%p153_p7)
}
  0xfc   :  { %108 = dma.vmem_to_hbm [thread:$0]  %s106_s20, 32, %s209_s3, [#allocation4]  }
  0xfd   :  { %157 = dma.done.wait [#allocation4], 32  }
  0xfe   :  { %158 = vsyncadd [#allocation4], 4294967264 }
  0xff   :  { %112 = vsyncpa [#allocation4], 1 }

</bundles_post_ra>
